<compile_context>
chip_gen: v6e
topology: v6e:2x2x1
jax: 0.10.0
libtpu: 0.0.40
codegen_flags: <defaults>
</compile_context>

<pallas_src>
import jax
import jax.numpy as jnp
from jax.experimental import pallas as pl
from jax.experimental.pallas import tpu as pltpu


VMEM_LIMIT = 48 * 1024 * 1024     # fits v7x's 64 MiB physical VMEM with headroom

# Measured tiled-copy roofline (fraction of HBM BW) per A-tile width (tk).
_TK_BW = {256: 0.63, 512: 0.85, 1024: 0.86, 2048: 0.88}


def choose_tiling(n):
    """Pick (n_pad, tm, tk) for the dense-A GraphConv layers.

    tk (A column / reduction tile) is chosen by minimizing
        estimated_time ~ padded_bytes / achieved_HBM_fraction(tk)
    so large graphs get big tiles (long contiguous DMA rows, few grid steps)
    while small graphs don't pay quadratic padding waste.  tm (row tile) is
    512 when it divides n_pad and still leaves >= 2 row tiles (so both v7x
    TensorCores get work via the 'parallel' row axis), else 256.
    """
    n = max(int(n), 1)
    best = None
    for tk, bw in _TK_BW.items():
        n_pad = -(-n // tk) * tk
        cost = (n_pad * n_pad) / bw
        if best is None or cost < best[0]:
            best = (cost, tk, n_pad)
    _, tk, n_pad = best
    tm = 512 if (n_pad % 512 == 0 and n_pad >= 2 * 512) else 256
    return n_pad, tm, tk


# ---------------------------------------------------------------------------
# Kernel (per layer): tiled GraphConv -> ReLU -> eval-mode BatchNorm.
#   grid = (row_tiles, k_tiles); the K (neighbor reduction) axis is last and
#   "arbitrary", the row axis is "parallel" (megacore on v7x).
# ---------------------------------------------------------------------------
def _graphconv_bn_kernel(a_ref, hn_ref, hs_ref, wr_ref, ws_ref,
                         b_ref, g_ref, c_ref, o_ref, acc_ref):
    k = pl.program_id(1)

    @pl.when(k == 0)
    def _():
        acc_ref[...] = jnp.zeros_like(acc_ref)

    # (tm, tk) bf16 @ (tk, f_in) bf16 -> f32 accumulate (native MXU dtype).
    # This is the HBM-bound A stream; everything else is epilogue.
    acc_ref[...] += jnp.dot(a_ref[...], hn_ref[...],
                            preferred_element_type=jnp.float32)

    @pl.when(k == pl.num_programs(1) - 1)
    def _():
        # PyG GraphConv: lin_rel(sum_j w_ij x_j) + lin_root(x_i) + bias.
        # Both epilogue matmuls stay in f32 — keeps full precision of the
        # aggregated sums (review correctness concern); negligible cost.
        out = (jnp.dot(acc_ref[...], wr_ref[...],
                       preferred_element_type=jnp.float32)
               + jnp.dot(hs_ref[...].astype(jnp.float32), ws_ref[...],
                         preferred_element_type=jnp.float32)
               + b_ref[...])
        out = jnp.maximum(out, 0.0)              # ReLU (conv -> relu -> bn)
        out = out * g_ref[...] + c_ref[...]      # eval-mode BatchNorm (folded)
        o_ref[...] = out.astype(o_ref.dtype)


def graphconv_bn(A, h, w_rel, w_root, b, g, c, *, out_dtype, tm, tk):
    n = A.shape[0]
    f_in = h.shape[1]
    f_out = w_rel.shape[1]
    assert n % tm == 0 and n % tk == 0, (n, tm, tk)
    grid = (n // tm, n // tk)
    # NOTE: if xprof still shows exposed DMA at grid-step boundaries after the
    # tile-size increase, add pipeline_mode=pl.Buffered(3) on the A BlockSpec
    # and sweep 2-4.
    return pl.pallas_call(
        _graphconv_bn_kernel,
        grid=grid,
        in_specs=[
            pl.BlockSpec((tm, tk), lambda i, k: (i, k)),       # A tile (dominant stream)
            pl.BlockSpec((tk, f_in), lambda i, k: (k, 0)),     # neighbor rows of h
            pl.BlockSpec((tm, f_in), lambda i, k: (i, 0)),     # root rows of h
            pl.BlockSpec((f_in, f_out), lambda i, k: (0, 0)),  # w_rel (f32)
            pl.BlockSpec((f_in, f_out), lambda i, k: (0, 0)),  # w_root (f32)
            pl.BlockSpec((1, f_out), lambda i, k: (0, 0)),     # bias
            pl.BlockSpec((1, f_out), lambda i, k: (0, 0)),     # bn scale
            pl.BlockSpec((1, f_out), lambda i, k: (0, 0)),     # bn shift
        ],
        out_specs=pl.BlockSpec((tm, f_out), lambda i, k: (i, 0)),
        out_shape=jax.ShapeDtypeStruct((n, f_out), out_dtype),
        scratch_shapes=[pltpu.VMEM((tm, f_in), jnp.float32)],
        compiler_params=pltpu.CompilerParams(
            dimension_semantics=("parallel", "arbitrary"),
            vmem_limit_bytes=VMEM_LIMIT),
    )(A, h, h, w_rel, w_root, b, g, c)


# ---------------------------------------------------------------------------
# Glue (plain JAX): bf16 dense adjacency build, SAGPooling score edge-scatter,
# per-graph top-1 gather, global_sort_pool padding, dropout (eval identity),
# and the tiny MLP head (not worth a pallas_call).
# ---------------------------------------------------------------------------
def amygnn_forward(x, src, dst, edge_weight, batch, num_graphs, p):
    N = x.shape[0]
    n_pad, tm, tk = choose_tiling(N)

    # A[i, j] = sum of edge weights over edges j -> i (PyG "add" aggregation),
    # built directly in bf16 (no f32 N^2 intermediate + cast pass), zero-padded
    # to the tile grid.
    A = jnp.zeros((n_pad, n_pad), jnp.bfloat16).at[dst, src].add(
        edge_weight.astype(jnp.bfloat16))

    h0 = jnp.zeros((n_pad, x.shape[1]), jnp.bfloat16).at[:N].set(
        x.astype(jnp.bfloat16))

    # Padded rows N..n_pad pick up bias/BN values after layer 1; they never
    # contaminate real rows (their A columns are zero) and are sliced off
    # before pooling.
    h1 = graphconv_bn(A, h0, p['w1r'], p['w1s'], p['b1'], p['g1'], p['c1'],
                      out_dtype=jnp.bfloat16, tm=tm, tk=tk)
    h2 = graphconv_bn(A, h1, p['w2r'], p['w2s'], p['b2'], p['g2'], p['c2'],
                      out_dtype=jnp.bfloat16, tm=tm, tk=tk)
    h3 = graphconv_bn(A, h2, p['w3r'], p['w3s'], p['b3'], p['g3'], p['c3'],
                      out_dtype=jnp.float32, tm=tm, tk=tk)[:N]

    # SAGPooling score GNN: GraphConv(32 -> 1) on the *unweighted* multigraph
    # adjacency, expressed as a per-edge scatter so that adjacency is never
    # materialized:  score_i = sum_{edges j->i} (h3_j . wsr) + h3_i . wss + bs
    t = h3 @ p['wsr'].T                                            # [N, 1]
    s = (jnp.zeros((N, 1), jnp.float32).at[dst].add(t[src])
         + h3 @ p['wss'].T + p['bs'])[:, 0]                        # [N]

    # SAGPooling(ratio=1e-5): ceil(1e-5 * n) = 1 node per graph -> argmax,
    # scaled by tanh(score).
    gids = jnp.arange(num_graphs, dtype=jnp.int32)
    member = batch[None, :] == gids[:, None]                       # [B, N]
    masked = jnp.where(member, s[None, :], -jnp.inf)
    perm = jnp.argmax(masked, axis=1)                              # [B]
    x_pool = h3[perm] * jnp.tanh(s[perm])[:, None]                 # [B, 32]

    # global_sort_pool(k=2): exactly 1 node/graph -> pad second slot with 0.
    z = jnp.concatenate([x_pool, jnp.zeros_like(x_pool)], axis=1)  # [B, 64]

    # F.dropout(p=0.4) in eval mode is identity.
    # MLP head in plain jnp (~10 KFLOP): a separate pallas_call costs more in
    # launch + DMA setup than the compute.
    h = jnp.maximum(z @ p['wl'] + p['bl'], 0.0)
    h = h @ p['wl1'] + p['bl1']
    h = h @ p['wl2'] + p['bl2']
    return jax.nn.log_softmax(h, axis=1)


# ---------------------------------------------------------------------------
# Deterministic parameter initialization (shapes from AMYGNN.__init__).
# GraphConv / head weights stay f32 (tiny; the HBM-bound stream is A, not W).
# ---------------------------------------------------------------------------
def init_params(key, f_in, hidden):
    ks = jax.random.split(key, 24)

    def dense(k, fi, fo):
        return jax.random.normal(k, (fi, fo), jnp.float32) / jnp.sqrt(float(fi))

    def bias(k, fo):
        return 0.1 * jax.random.normal(k, (1, fo), jnp.float32)

    def bn(kg, kb, dim, eps=1e-6):
        gamma = 1.0 + 0.1 * jax.random.normal(kg, (dim,), jnp.float32)
        beta = 0.1 * jax.random.normal(kb, (dim,), jnp.float32)
        mean = jnp.zeros((dim,), jnp.float32)      # eval-mode running stats
        var = jnp.ones((dim,), jnp.float32)
        scale = gamma / jnp.sqrt(var + eps)
        shift = beta - mean * scale
        return scale.reshape(1, dim), shift.reshape(1, dim)

    p = {}
    p['w1r'] = dense(ks[0], f_in, hidden)
    p['w1s'] = dense(ks[1], f_in, hidden)
    p['b1'] = bias(ks[2], hidden)
    p['g1'], p['c1'] = bn(ks[3], ks[4], hidden)

    p['w2r'] = dense(ks[5], hidden, 64)
    p['w2s'] = dense(ks[6], hidden, 64)
    p['b2'] = bias(ks[7], 64)
    p['g2'], p['c2'] = bn(ks[8], ks[9], 64)

    p['w3r'] = dense(ks[10], 64, 32)
    p['w3s'] = dense(ks[11], 64, 32)
    p['b3'] = bias(ks[12], 32)
    p['g3'], p['c3'] = bn(ks[13], ks[14], 32)

    # SAGPooling score GNN: GraphConv(32, 1) stored as row vectors [1, 32].
    p['wsr'] = dense(ks[15], 32, 1).reshape(1, 32)
    p['wss'] = dense(ks[16], 32, 1).reshape(1, 32)
    p['bs'] = jnp.zeros((1, 1), jnp.float32)

    p['wl'] = dense(ks[17], 64, 32);  p['bl'] = bias(ks[18], 32)
    p['wl1'] = dense(ks[19], 32, 16); p['bl1'] = bias(ks[20], 16)
    p['wl2'] = dense(ks[21], 16, 2);  p['bl2'] = bias(ks[22], 2)
    return p


if __name__ == "__main__":
    B = 2          # graphs
    n_per = 8      # nodes per graph
    N = B * n_per
    F_IN = 16      # num_node_features
    HIDDEN = 64    # bn1 = BatchNorm1d(64) forces hidden_channels == 64

    # Two bidirectional chain graphs.
    src_l, dst_l = [], []
    for g in range(B):
        base = g * n_per
        for i in range(n_per - 1):
            src_l += [base + i, base + i + 1]
            dst_l += [base + i + 1, base + i]
    src = jnp.array(src_l, dtype=jnp.int32)
    dst = jnp.array(dst_l, dtype=jnp.int32)
    E = src.shape[0]

    key = jax.random.PRNGKey(0)
    key, kx, kw = jax.random.split(key, 3)
    x = jax.random.normal(kx, (N, F_IN), dtype=jnp.float32)
    edge_weight = jax.random.uniform(kw, (E,), minval=0.5, maxval=1.5,
                                     dtype=jnp.float32)
    batch = jnp.repeat(jnp.arange(B, dtype=jnp.int32), n_per)

    params = init_params(jax.random.PRNGKey(12345), F_IN, HIDDEN)

    out = amygnn_forward(x, src, dst, edge_weight, batch, B, params)
    out = jax.block_until_ready(out)

    assert out.shape == (B, 2)
    assert bool(jnp.all(jnp.isfinite(out)))
    # rows of exp(log_softmax) must sum to 1
    assert bool(jnp.all(jnp.abs(jnp.sum(jnp.exp(out), axis=1) - 1.0) < 1e-3))
    print("KERNEL_OK")
</pallas_src>

<mosaic_0001>
module attributes {stable_mosaic.version = 11 : i64} {
  func.func @_graphconv_bn_kernel(%arg0: i32, %arg1: i32, %arg2: memref<256x256xbf16, #tpu.memory_space<vmem>>, %arg3: memref<256x16xbf16, #tpu.memory_space<vmem>>, %arg4: memref<256x16xbf16, #tpu.memory_space<vmem>>, %arg5: memref<16x64xf32, #tpu.memory_space<vmem>>, %arg6: memref<16x64xf32, #tpu.memory_space<vmem>>, %arg7: memref<1x64xf32, #tpu.memory_space<vmem>>, %arg8: memref<1x64xf32, #tpu.memory_space<vmem>>, %arg9: memref<1x64xf32, #tpu.memory_space<vmem>>, %arg10: memref<256x64xbf16, #tpu.memory_space<vmem>>, %arg11: memref<256x16xf32, #tpu.memory_space<vmem>>) attributes {dimension_semantics = [#tpu.dimension_semantics<parallel>, #tpu.dimension_semantics<arbitrary>], iteration_bounds = array<i64: 1, 1>, scalar_prefetch = 0 : i64, scratch_operands = 1 : i64, tpu.core_type = #tpu.core_type<tc>, window_params = [{transform_indices = @transform_0, window_bounds = array<i64: 256, 256>}, {transform_indices = @transform_1, window_bounds = array<i64: 256, 16>}, {transform_indices = @transform_2, window_bounds = array<i64: 256, 16>}, {pipeline_mode = #tpu.pipeline_mode<synchronous>, transform_indices = @transform_3, window_bounds = array<i64: 16, 64>}, {pipeline_mode = #tpu.pipeline_mode<synchronous>, transform_indices = @transform_4, window_bounds = array<i64: 16, 64>}, {pipeline_mode = #tpu.pipeline_mode<synchronous>, transform_indices = @transform_5, window_bounds = array<i64: 1, 64>}, {pipeline_mode = #tpu.pipeline_mode<synchronous>, transform_indices = @transform_6, window_bounds = array<i64: 1, 64>}, {pipeline_mode = #tpu.pipeline_mode<synchronous>, transform_indices = @transform_7, window_bounds = array<i64: 1, 64>}, {transform_indices = @transform_8, window_bounds = array<i64: 256, 64>}]} {
    %c0_i32 = arith.constant 0 : i32
    %0 = arith.cmpi eq, %arg1, %c0_i32 : i32
    %1 = arith.extui %0 : i1 to i32
    %c0_i32_0 = arith.constant 0 : i32
    %2 = arith.cmpi ne, %1, %c0_i32_0 : i32
    scf.if %2 {
      %cst_10 = arith.constant 0.000000e+00 : f32
      %12 = vector.broadcast %cst_10 : f32 to vector<256x16xf32>
      %c0_11 = arith.constant 0 : index
      %c0_12 = arith.constant 0 : index
      %13 = vector.load %arg11[%c0_11, %c0_12] : memref<256x16xf32, #tpu.memory_space<vmem>>, vector<256x16xf32>
      tpu.vector_store %arg11[%c0_11, %c0_12], %12 {strides = array<i32>} : memref<256x16xf32, #tpu.memory_space<vmem>>, vector<256x16xf32>,
    } else {
    }
    %c0 = arith.constant 0 : index
    %c0_1 = arith.constant 0 : index
    %3 = vector.load %arg11[%c0, %c0_1] : memref<256x16xf32, #tpu.memory_space<vmem>>, vector<256x16xf32>
    %c0_2 = arith.constant 0 : index
    %c0_3 = arith.constant 0 : index
    %4 = vector.load %arg2[%c0_2, %c0_3] : memref<256x256xbf16, #tpu.memory_space<vmem>>, vector<256x256xbf16>
    %c0_4 = arith.constant 0 : index
    %c0_5 = arith.constant 0 : index
    %5 = vector.load %arg3[%c0_4, %c0_5] : memref<256x16xbf16, #tpu.memory_space<vmem>>, vector<256x16xbf16>
    %cst = arith.constant dense<0.000000e+00> : vector<256x16xf32>
    %6 = tpu.matmul %4, %5, %cst {dimension_numbers = #tpu.dot_dimension_numbers<[1], [0], [0], [1], [0, 0, 1, 1], [], []>} : vector<256x256xbf16>, vector<256x16xbf16>, vector<256x16xf32> -> vector<256x16xf32>
    %7 = arith.addf %3, %6 : vector<256x16xf32>
    %c0_6 = arith.constant 0 : index
    %c0_7 = arith.constant 0 : index
    %8 = vector.load %arg11[%c0_6, %c0_7] : memref<256x16xf32, #tpu.memory_space<vmem>>, vector<256x16xf32>
    tpu.vector_store %arg11[%c0_6, %c0_7], %7 {strides = array<i32>} : memref<256x16xf32, #tpu.memory_space<vmem>>, vector<256x16xf32>,
    %c0_i32_8 = arith.constant 0 : i32
    %9 = arith.cmpi eq, %arg1, %c0_i32_8 : i32
    %10 = arith.extui %9 : i1 to i32
    %c0_i32_9 = arith.constant 0 : i32
    %11 = arith.cmpi ne, %10, %c0_i32_9 : i32
    scf.if %11 {
      %c0_10 = arith.constant 0 : index
      %c0_11 = arith.constant 0 : index
      %12 = vector.load %arg11[%c0_10, %c0_11] : memref<256x16xf32, #tpu.memory_space<vmem>>, vector<256x16xf32>
      %c0_12 = arith.constant 0 : index
      %c0_13 = arith.constant 0 : index
      %13 = vector.load %arg5[%c0_12, %c0_13] : memref<16x64xf32, #tpu.memory_space<vmem>>, vector<16x64xf32>
      %cst_14 = arith.constant dense<0.000000e+00> : vector<256x64xf32>
      %14 = tpu.matmul %12, %13, %cst_14 {dimension_numbers = #tpu.dot_dimension_numbers<[1], [0], [0], [1], [0, 0, 1, 1], [], []>} : vector<256x16xf32>, vector<16x64xf32>, vector<256x64xf32> -> vector<256x64xf32>
      %c0_15 = arith.constant 0 : index
      %c0_16 = arith.constant 0 : index
      %15 = vector.load %arg4[%c0_15, %c0_16] : memref<256x16xbf16, #tpu.memory_space<vmem>>, vector<256x16xbf16>
      %16 = arith.extf %15 : vector<256x16xbf16> to vector<256x16xf32>
      %c0_17 = arith.constant 0 : index
      %c0_18 = arith.constant 0 : index
      %17 = vector.load %arg6[%c0_17, %c0_18] : memref<16x64xf32, #tpu.memory_space<vmem>>, vector<16x64xf32>
      %cst_19 = arith.constant dense<0.000000e+00> : vector<256x64xf32>
      %18 = tpu.matmul %16, %17, %cst_19 {dimension_numbers = #tpu.dot_dimension_numbers<[1], [0], [0], [1], [0, 0, 1, 1], [], []>} : vector<256x16xf32>, vector<16x64xf32>, vector<256x64xf32> -> vector<256x64xf32>
      %19 = arith.addf %14, %18 : vector<256x64xf32>
      %c0_20 = arith.constant 0 : index
      %c0_21 = arith.constant 0 : index
      %20 = vector.load %arg7[%c0_20, %c0_21] : memref<1x64xf32, #tpu.memory_space<vmem>>, vector<1x64xf32>
      %21 = vector.broadcast %20 : vector<1x64xf32> to vector<256x64xf32>
      %22 = arith.addf %19, %21 : vector<256x64xf32>
      %cst_22 = arith.constant 0.000000e+00 : f32
      %23 = vector.broadcast %cst_22 : f32 to vector<256x64xf32>
      %24 = arith.maximumf %22, %23 : vector<256x64xf32>
      %c0_23 = arith.constant 0 : index
      %c0_24 = arith.constant 0 : index
      %25 = vector.load %arg8[%c0_23, %c0_24] : memref<1x64xf32, #tpu.memory_space<vmem>>, vector<1x64xf32>
      %26 = vector.broadcast %25 : vector<1x64xf32> to vector<256x64xf32>
      %27 = arith.mulf %24, %26 : vector<256x64xf32>
      %c0_25 = arith.constant 0 : index
      %c0_26 = arith.constant 0 : index
      %28 = vector.load %arg9[%c0_25, %c0_26] : memref<1x64xf32, #tpu.memory_space<vmem>>, vector<1x64xf32>
      %29 = vector.broadcast %28 : vector<1x64xf32> to vector<256x64xf32>
      %30 = arith.addf %27, %29 : vector<256x64xf32>
      %31 = arith.truncf %30 : vector<256x64xf32> to vector<256x64xbf16>
      %c0_27 = arith.constant 0 : index
      %c0_28 = arith.constant 0 : index
      %32 = vector.load %arg10[%c0_27, %c0_28] : memref<256x64xbf16, #tpu.memory_space<vmem>>, vector<256x64xbf16>
      tpu.vector_store %arg10[%c0_27, %c0_28], %31 {strides = array<i32>} : memref<256x64xbf16, #tpu.memory_space<vmem>>, vector<256x64xbf16>,
    } else {
    }
    return
  }
  func.func @transform_0(%arg0: i32, %arg1: i32) -> (i32, i32) {
    %c0_i32 = arith.constant 0 : i32
    return %arg0, %arg1 : i32, i32
  }
  func.func @transform_1(%arg0: i32, %arg1: i32) -> (i32, i32) {
    %c0_i32 = arith.constant 0 : i32
    %c0_i32_0 = arith.constant 0 : i32
    return %arg1, %c0_i32 : i32, i32
  }
  func.func @transform_2(%arg0: i32, %arg1: i32) -> (i32, i32) {
    %c0_i32 = arith.constant 0 : i32
    %c0_i32_0 = arith.constant 0 : i32
    return %arg0, %c0_i32 : i32, i32
  }
  func.func @transform_3(%arg0: i32, %arg1: i32) -> (i32, i32) {
    %c0_i32 = arith.constant 0 : i32
    %c0_i32_0 = arith.constant 0 : i32
    %c0_i32_1 = arith.constant 0 : i32
    return %c0_i32, %c0_i32_0 : i32, i32
  }
  func.func @transform_4(%arg0: i32, %arg1: i32) -> (i32, i32) {
    %c0_i32 = arith.constant 0 : i32
    %c0_i32_0 = arith.constant 0 : i32
    %c0_i32_1 = arith.constant 0 : i32
    return %c0_i32, %c0_i32_0 : i32, i32
  }
  func.func @transform_5(%arg0: i32, %arg1: i32) -> (i32, i32) {
    %c0_i32 = arith.constant 0 : i32
    %c0_i32_0 = arith.constant 0 : i32
    %c0_i32_1 = arith.constant 0 : i32
    return %c0_i32, %c0_i32_0 : i32, i32
  }
  func.func @transform_6(%arg0: i32, %arg1: i32) -> (i32, i32) {
    %c0_i32 = arith.constant 0 : i32
    %c0_i32_0 = arith.constant 0 : i32
    %c0_i32_1 = arith.constant 0 : i32
    return %c0_i32, %c0_i32_0 : i32, i32
  }
  func.func @transform_7(%arg0: i32, %arg1: i32) -> (i32, i32) {
    %c0_i32 = arith.constant 0 : i32
    %c0_i32_0 = arith.constant 0 : i32
    %c0_i32_1 = arith.constant 0 : i32
    return %c0_i32, %c0_i32_0 : i32, i32
  }
  func.func @transform_8(%arg0: i32, %arg1: i32) -> (i32, i32) {
    %c0_i32 = arith.constant 0 : i32
    %c0_i32_0 = arith.constant 0 : i32
    return %arg0, %c0_i32 : i32, i32
  }
}

</mosaic_0001>

<bundles_post_ra>
// kernel: tpu_custom_call.1
= control target key start
LH: loop header
LB: loop body
LE: loop exit
PB: predicated region body
PF: predicated region fallthrough
CT: control target
= control target key end

     0   :  { %13 = vsyncpa [#allocation4], 0  ;;  %s2351_s27 = smov [#allocation3]   ;;  %s3064_s0 = inlined_call_operand.vmem [shape: bf16[256,256], index: 0, kind: input, shape index: {}]   ;;  %s3065_s1 = inlined_call_operand.vmem [shape: bf16[256,16], index: 1, kind: input, shape index: {}]   ;;  %s3066_s2 = inlined_call_operand.vmem [shape: bf16[256,16], index: 2, kind: input, shape index: {}]   ;;  %s3067_s3 = inlined_call_operand.vmem [shape: f32[16,64], index: 3, kind: input, shape index: {}]   ;;  %s3068_s4 = inlined_call_operand.hbm [shape: f32[16,64], index: 4, kind: input, shape index: {}]   ;;  %s3069_s5 = inlined_call_operand.vmem [shape: f32[1,64], index: 5, kind: input, shape index: {}]   ;;  %s3070_s6 = inlined_call_operand.vmem [shape: f32[1,64], index: 6, kind: input, shape index: {}]   ;;  %s3071_s7 = inlined_call_operand.vmem [shape: f32[1,64], index: 7, kind: input, shape index: {}]   ;;  %s3072_s8 = inlined_call_operand.vmem [shape: bf16[256,64], index: 8, kind: output, shape index: {}]  }
   0x1   :  { %s27_s28 = sshll.u32 %s2351_s27, 4  ;;  %s28_s28 = int_to_ptr.vmem [resolvable:$true] %s27_s28 }
   0x2   :  { %s2337_s29 = scalar_lea.vmem %s28_s28, 256  ;;  %p2342_p1 = scmp.lt.s32.totalorder %s28_s28, %s28_s28 }
   0x3   :  { %p2338_p0 = scmp.ne.s32.totalorder %s28_s28, %s2337_s29  ;;  %p2343_p2 = scmp.lt.s32.totalorder %s2337_s29, %s2337_s29 }
   0x5   :  { %p2344_p3 = por %p2343_p2, %p2342_p1 }
   0x7   :  { %p2345_p4 = pnand %p2344_p3, %p2338_p0 }
   0x9   :  { %2348 = shalt.err (!%p2345_p4)
}
   0xa   :  { %s2352_s30 = smov 128   ;;  %s2353_s9 = smov 8  }
   0xb   :  { %33 = dma.hbm_to_vmem [thread:$0]  %s3068_s4, 256, %s28_s28, [#allocation4], %s2352_s30, %s2352_s30, %s2353_s9  }
   0xc   :  { %2349 = dma.done.wait [#allocation4], 256  }
   0xd   :  { %2350 = vsyncadd [#allocation4], 4294967040  ;;  %v2265_v0 = vld [vmem:[%s3065_s1 + $0x78] sm:$0xff]   ;;  %v2267_v2 = vld [vmem:[%s3065_s1 + $0x70] sm:$0xff]   ;;  %vm48_vm0 = vcmask 130048   ;;  %vm1681_vm1 = vcmask 519168  }
   0xe   :  { %v2266_v1 = vld [vmem:[%s3065_s1 + $0x38] sm:$0xff]   ;;  %1977 = vmatprep.subr.bf16.mxu0 %v2265_v0  ;;  %v2268_v3 = vld [vmem:[%s3065_s1 + $0x30] sm:$0xff]   ;;  %v2269_v4 = vld [vmem:[%s3065_s1 + $0x68] sm:$0xff]  }
   0xf   :  { %1978 = vmatpush3.bf16.msra.mxu0 %v2266_v1  ;;  %v2270_v5 = vld [vmem:[%s3065_s1 + $0x28] sm:$0xff]   ;;  %v2271_v6 = vld [vmem:[%s3065_s1 + $0x60] sm:$0xff]   ;;  %v2273_v8 = vld [vmem:[%s3065_s1 + $0x58] sm:$0xff]  }
  0x10   :  { %1979 = vmatprep.subr.bf16.mxu0 %v2267_v2  ;;  %v2272_v7 = vld [vmem:[%s3065_s1 + $0x20] sm:$0xff]   ;;  %v2274_v9 = vld [vmem:[%s3065_s1 + $0x18] sm:$0xff]   ;;  %v2275_v10 = vld [vmem:[%s3065_s1 + $0x50] sm:$0xff]  }
  0x11   :  { %v2283_v11 = vld [vmem:[%s3064_s0 + $0x4] ss:$8 sps:$4 sm:$0xff]   ;;  %v2276_v12 = vld [vmem:[%s3065_s1 + $0x10] sm:$0xff]   ;;  %v2281_v17 = vld [vmem:[%s3064_s0] ss:$8 sps:$4 sm:$0xff]  }
  0x12   :  { %465 = vmatprep.mubr.bf16.mxu0 %v2283_v11  ;;  %v2277_v13 = vld [vmem:[%s3065_s1 + $0x48] sm:$0xff]   ;;  %v2279_v15 = vld [vmem:[%s3065_s1 + $0x40] sm:$0xff]   ;;  %v2284_v18 = vld [vmem:[%s3064_s0 + $0x14] ss:$8 sps:$4 sm:$0xff]  }
  0x13   :  { %1980 = vmatpush3.bf16.msra.mxu0 %v2268_v3  ;;  %v2278_v14 = vld [vmem:[%s3065_s1 + $0x8] sm:$0xff]   ;;  %v2280_v16 = vld [vmem:[%s3065_s1] sm:$0xff]   ;;  %v2286_v21 = vld [vmem:[%s3064_s0 + $0x10] ss:$8 sps:$4 sm:$0xff]  }
  0x14   :  { %1981 = vmatprep.subr.bf16.mxu0 %v2269_v4  ;;  %v761_v19 = vld [vmem:[#allocation3 + $0x8] sm:$0xff]  ;;  %v760_v20 = vld [vmem:[#allocation3] sm:$0xff]  ;;  %v1963_v28 = vld [vmem:[%s3066_s2 + $0x10] sm:$0xff]  }
  0x15   :  { %2157 = vmatprep.subr.mxu1 %v761_v19  ;;  %v1899_v22 = vld [vmem:[%s3066_s2] sm:$0xff]   ;;  %v1962_v23 = vld [vmem:[%s3066_s2 + $0x8] sm:$0xff]   ;;  %v1908_v30 = vunpack.c.l.bf16 %v1963_v28  ;;  %v1964_v31 = vld [vmem:[%s3066_s2 + $0x18] sm:$0xff]   ;;  %v1909_v33 = vunpack.c.h.bf16 %v1963_v28 }
  0x16   :  { %v2287_v24 = vld [vmem:[%s3064_s0 + $0x24] ss:$8 sps:$4 sm:$0xff]   ;;  %2158 = vmatpush3.msra.mxu1 %v761_v19  ;;  %v1900_v25 = vunpack.c.l.bf16 %v1899_v22  ;;  %v1901_v26 = vunpack.c.h.bf16 %v1899_v22  ;;  %v1904_v27 = vunpack.c.l.bf16 %v1962_v23  ;;  %v1905_v29 = vunpack.c.h.bf16 %v1962_v23  ;;  %v2289_v32 = vld [vmem:[%s3064_s0 + $0x20] ss:$8 sps:$4 sm:$0xff]   ;;  %v2290_v34 = vld [vmem:[%s3064_s0 + $0x34] ss:$8 sps:$4 sm:$0xff]  }
  0x17   :  { %1982 = vmatpush3.bf16.msra.mxu0 %v2270_v5  ;;  %2159 = vmatprep.subr.mxu1 %v760_v20  ;;  %v1912_v35 = vunpack.c.l.bf16 %v1964_v31  ;;  %v1965_v36 = vld [vmem:[%s3066_s2 + $0x20] sm:$0xff]   ;;  %v1913_v37 = vunpack.c.h.bf16 %v1964_v31  ;;  %v1966_v39 = vld [vmem:[%s3066_s2 + $0x28] sm:$0xff]   ;;  %v2292_v40 = vld [vmem:[%s3064_s0 + $0x30] ss:$8 sps:$4 sm:$0xff]  }
  0x18   :  { %1983 = vmatprep.subr.bf16.mxu0 %v2271_v6  ;;  %2160 = vmatpush3.msra.mxu1 %v760_v20  ;;  %v1916_v38 = vunpack.c.l.bf16 %v1965_v36  ;;  %v1917_v41 = vunpack.c.h.bf16 %v1965_v36  ;;  %v2293_v42 = vld [vmem:[%s3064_s0 + $0x44] ss:$8 sps:$4 sm:$0xff]   ;;  %v1920_v43 = vunpack.c.l.bf16 %v1966_v39  ;;  %v1967_v44 = vld [vmem:[%s3066_s2 + $0x30] sm:$0xff]   ;;  %v1921_v45 = vunpack.c.h.bf16 %v1966_v39  ;;  %v1968_v47 = vld [vmem:[%s3066_s2 + $0x38] sm:$0xff]  }
  0x19   :  { %2161 = vmatprep.mubr.msk.f32.mxu1 %vm48_vm0, %v1900_v25  ;;  %v1924_v46 = vunpack.c.l.bf16 %v1967_v44  ;;  %v2295_v48 = vld [vmem:[%s3064_s0 + $0x40] ss:$8 sps:$4 sm:$0xff]   ;;  %v1925_v49 = vunpack.c.h.bf16 %v1967_v44  ;;  %v2296_v50 = vld [vmem:[%s3064_s0 + $0x54] ss:$8 sps:$4 sm:$0xff]   ;;  %v1928_v51 = vunpack.c.l.bf16 %v1968_v47  ;;  %v1929_v53 = vunpack.c.h.bf16 %v1968_v47  ;;  %v2298_v56 = vld [vmem:[%s3064_s0 + $0x50] ss:$8 sps:$4 sm:$0xff]  }
  0x1a   :  { %2162 = vmatmul.mubr.msk.f32.vlgmr.msra.gmra.mxu1 %vm48_vm0, %v1901_v26  ;;  %v1969_v52 = vld [vmem:[%s3066_s2 + $0x40] sm:$0xff]   ;;  %v1970_v55 = vld [vmem:[%s3066_s2 + $0x48] sm:$0xff]   ;;  %v1971_v60 = vld [vmem:[%s3066_s2 + $0x50] sm:$0xff]  }
  0x1b   :  { %1984 = vmatpush3.bf16.msra.mxu0 %v2272_v7  ;;  %2164 = vmatprep.mubr.msk.f32.mxu1 %vm48_vm0, %v1904_v27  ;;  %v1932_v54 = vunpack.c.l.bf16 %v1969_v52  ;;  %v1933_v57 = vunpack.c.h.bf16 %v1969_v52  ;;  %v2299_v58 = vld [vmem:[%s3064_s0 + $0x64] ss:$8 sps:$4 sm:$0xff]   ;;  %v1936_v59 = vunpack.c.l.bf16 %v1970_v55  ;;  %v1937_v61 = vunpack.c.h.bf16 %v1970_v55  ;;  %v1972_v63 = vld [vmem:[%s3066_s2 + $0x58] sm:$0xff]   ;;  %v2301_v0 = vld [vmem:[%s3064_s0 + $0x60] ss:$8 sps:$4 sm:$0xff]  }
  0x1c   :  { %1985 = vmatprep.subr.bf16.mxu0 %v2273_v8  ;;  %v1940_v62 = vunpack.c.l.bf16 %v1971_v60  ;;  %v1941_v1 = vunpack.c.h.bf16 %v1971_v60  ;;  %v2302_v2 = vld [vmem:[%s3064_s0 + $0x74] ss:$8 sps:$4 sm:$0xff]   ;;  %v1944_v3 = vunpack.c.l.bf16 %v1972_v63  ;;  %v1945_v4 = vunpack.c.h.bf16 %v1972_v63  ;;  %v2304_v5 = vld [vmem:[%s3064_s0 + $0x70] ss:$8 sps:$4 sm:$0xff]   ;;  %v2305_v6 = vld [vmem:[%s3064_s0 + $0x84] ss:$8 sps:$4 sm:$0xff]  }
  0x1d   :  { %v2307_v7 = vld [vmem:[%s3064_s0 + $0x80] ss:$8 sps:$4 sm:$0xff]   ;;  %v2308_v8 = vld [vmem:[%s3064_s0 + $0x94] ss:$8 sps:$4 sm:$0xff]   ;;  %v2316_v28 = vld [vmem:[%s3064_s0 + $0xb0] ss:$8 sps:$4 sm:$0xff]  }
  0x1e   :  { %2165 = vmatmul.mubr.msk.f32.gmra.mxu1 %vm48_vm0, %v1905_v29  ;;  %v2313_v23 = vld [vmem:[%s3064_s0 + $0xa0] ss:$8 sps:$4 sm:$0xff]   ;;  %v2314_v25 = vld [vmem:[%s3064_s0 + $0xb4] ss:$8 sps:$4 sm:$0xff]   ;;  %v2317_v29 = vld [vmem:[%s3064_s0 + $0xc4] ss:$8 sps:$4 sm:$0xff]  }
  0x1f   :  { %1986 = vmatpush3.bf16.msra.mxu0 %v2274_v9  ;;  %2167 = vmatprep.mubr.msk.f32.mxu1 %vm48_vm0, %v1908_v30  ;;  %v2354_v9 = vmov 0.0   ;;  %v695_v26 = vld [vmem:[%s3067_s3 + $0x8] sm:$0xff]  ;;  %v694_v27 = vld [vmem:[%s3067_s3] sm:$0xff]  ;;  %v2320_v31 = vld [vmem:[%s3064_s0 + $0xd4] ss:$8 sps:$4 sm:$0xff]  }
  0x20   :  { %1987 = vmatprep.subr.bf16.mxu0 %v2275_v10  ;;  %49 = vst.msk [vmem:[#allocation2] sm:$0xff] %vm48_vm0, %v2354_v9  ;;  %50 = vst.msk [vmem:[#allocation2 + $0x8] sm:$0xff] %vm48_vm0, %v2354_v9  ;;  %v1973_v10 = vld [vmem:[%s3066_s2 + $0x60] sm:$0xff]   ;;  %2209 = vmatprep.subr.mxu1 %v695_v26  ;;  %v2328_v36 = vld [vmem:[%s3064_s0 + $0xf0] ss:$8 sps:$4 sm:$0xff]  }
  0x21   :  { %51 = vst.msk [vmem:[#allocation2 + $0x10] sm:$0xff] %vm48_vm0, %v2354_v9  ;;  %52 = vst.msk [vmem:[#allocation2 + $0x18] sm:$0xff] %vm48_vm0, %v2354_v9  ;;  %v1948_v11 = vunpack.c.l.bf16 %v1973_v10  ;;  %2210 = vmatpush3.msra.mxu1 %v695_v26  ;;  %v2319_v30 = vld [vmem:[%s3064_s0 + $0xc0] ss:$8 sps:$4 sm:$0xff]  }
  0x22   :  { %2168 = vmatmul.mubr.msk.f32.gmra.mxu1 %vm48_vm0, %v1909_v33  ;;  %53 = vst.msk [vmem:[#allocation2 + $0x20] sm:$0xff] %vm48_vm0, %v2354_v9  ;;  %54 = vst.msk [vmem:[#allocation2 + $0x28] sm:$0xff] %vm48_vm0, %v2354_v9  ;;  %2211 = vmatprep.subr.mxu1 %v694_v27  ;;  %v2323_v33 = vld [vmem:[%s3064_s0 + $0xe4] ss:$8 sps:$4 sm:$0xff]  }
  0x23   :  { %1988 = vmatpush3.bf16.msra.mxu0 %v2276_v12  ;;  %2170 = vmatprep.mubr.msk.f32.mxu1 %vm48_vm0, %v1912_v35  ;;  %55 = vst.msk [vmem:[#allocation2 + $0x30] sm:$0xff] %vm48_vm0, %v2354_v9  ;;  %56 = vst.msk [vmem:[#allocation2 + $0x38] sm:$0xff] %vm48_vm0, %v2354_v9  ;;  %v1949_v12 = vunpack.c.h.bf16 %v1973_v10  ;;  %v2326_v35 = vld [vmem:[%s3064_s0 + $0xf4] ss:$8 sps:$4 sm:$0xff]  }
  0x24   :  { %1989 = vmatprep.subr.bf16.mxu0 %v2277_v13  ;;  %57 = vst.msk [vmem:[#allocation2 + $0x40] sm:$0xff] %vm48_vm0, %v2354_v9  ;;  %58 = vst.msk [vmem:[#allocation2 + $0x48] sm:$0xff] %vm48_vm0, %v2354_v9  ;;  %v1974_v13 = vld [vmem:[%s3066_s2 + $0x68] sm:$0xff]   ;;  %2212 = vmatpush3.msra.mxu1 %v694_v27 }
  0x25   :  { %59 = vst.msk [vmem:[#allocation2 + $0x50] sm:$0xff] %vm48_vm0, %v2354_v9  ;;  %60 = vst.msk [vmem:[#allocation2 + $0x58] sm:$0xff] %vm48_vm0, %v2354_v9 }
  0x26   :  { %2171 = vmatmul.mubr.msk.f32.gmra.mxu1 %vm48_vm0, %v1913_v37  ;;  %61 = vst.msk [vmem:[#allocation2 + $0x60] sm:$0xff] %vm48_vm0, %v2354_v9  ;;  %62 = vst.msk [vmem:[#allocation2 + $0x68] sm:$0xff] %vm48_vm0, %v2354_v9 }
  0x27   :  { %1990 = vmatpush3.bf16.msra.mxu0 %v2278_v14  ;;  %2173 = vmatprep.mubr.msk.f32.mxu1 %vm48_vm0, %v1916_v38  ;;  %63 = vst.msk [vmem:[#allocation2 + $0x70] sm:$0xff] %vm48_vm0, %v2354_v9  ;;  %64 = vst.msk [vmem:[#allocation2 + $0x78] sm:$0xff] %vm48_vm0, %v2354_v9  ;;  %v1952_v14 = vunpack.c.l.bf16 %v1974_v13  ;;  %v81_v38 = vld [vmem:[#allocation2] sm:$0xff] }
  0x28   :  { %1991 = vmatprep.subr.bf16.mxu0 %v2279_v15  ;;  %65 = vst.msk [vmem:[#allocation2 + $0x80] sm:$0xff] %vm48_vm0, %v2354_v9  ;;  %66 = vst.msk [vmem:[#allocation2 + $0x88] sm:$0xff] %vm48_vm0, %v2354_v9  ;;  %v2310_v15 = vld [vmem:[%s3064_s0 + $0x90] ss:$8 sps:$4 sm:$0xff]  }
  0x29   :  { %67 = vst.msk [vmem:[#allocation2 + $0x90] sm:$0xff] %vm48_vm0, %v2354_v9  ;;  %68 = vst.msk [vmem:[#allocation2 + $0x98] sm:$0xff] %vm48_vm0, %v2354_v9 }
  0x2a   :  { %2174 = vmatmul.mubr.msk.f32.gmra.mxu1 %vm48_vm0, %v1917_v41  ;;  %69 = vst.msk [vmem:[#allocation2 + $0xa0] sm:$0xff] %vm48_vm0, %v2354_v9  ;;  %70 = vst.msk [vmem:[#allocation2 + $0xa8] sm:$0xff] %vm48_vm0, %v2354_v9 }
  0x2b   :  { %1992 = vmatpush3.bf16.msra.mxu0 %v2280_v16  ;;  %2176 = vmatprep.mubr.msk.f32.mxu1 %vm48_vm0, %v1920_v43  ;;  %71 = vst.msk [vmem:[#allocation2 + $0xb0] sm:$0xff] %vm48_vm0, %v2354_v9  ;;  %72 = vst.msk [vmem:[#allocation2 + $0xb8] sm:$0xff] %vm48_vm0, %v2354_v9  ;;  %v1953_v16 = vunpack.c.h.bf16 %v1974_v13  ;;  %v82_v43 = vld [vmem:[#allocation2 + $0x8] sm:$0xff]  ;;  %v88_v13 = vld [vmem:[#allocation2 + $0x38] sm:$0xff] }
  0x2c   :  { %73 = vst.msk [vmem:[#allocation2 + $0xc0] sm:$0xff] %vm48_vm0, %v2354_v9  ;;  %74 = vst.msk [vmem:[#allocation2 + $0xc8] sm:$0xff] %vm48_vm0, %v2354_v9 }
  0x2d   :  { %75 = vst.msk [vmem:[#allocation2 + $0xd0] sm:$0xff] %vm48_vm0, %v2354_v9  ;;  %76 = vst.msk [vmem:[#allocation2 + $0xd8] sm:$0xff] %vm48_vm0, %v2354_v9 }
  0x2e   :  { %466 = vmatmul.mubr.bf16.vlgmr.msra.gmra.mxu0 %v2281_v17  ;;  %2177 = vmatmul.mubr.msk.f32.gmra.mxu1 %vm48_vm0, %v1921_v45  ;;  %77 = vst.msk [vmem:[#allocation2 + $0xe0] sm:$0xff] %vm48_vm0, %v2354_v9  ;;  %78 = vst.msk [vmem:[#allocation2 + $0xe8] sm:$0xff] %vm48_vm0, %v2354_v9  ;;  %v2311_v17 = vld [vmem:[%s3064_s0 + $0xa4] ss:$8 sps:$4 sm:$0xff]  }
  0x2f   :  { %473 = vmatprep.mubr.bf16.mxu0 %v2284_v18  ;;  %2179 = vmatprep.mubr.msk.f32.mxu1 %vm48_vm0, %v1924_v46  ;;  %79 = vst.msk [vmem:[#allocation2 + $0xf0] sm:$0xff] %vm48_vm0, %v2354_v9  ;;  %80 = vst.msk [vmem:[#allocation2 + $0xf8] sm:$0xff] %vm48_vm0, %v2354_v9  ;;  %v1975_v18 = vld [vmem:[%s3066_s2 + $0x70] sm:$0xff]  }
  0x30   :  { %v1956_v19 = vunpack.c.l.bf16 %v1975_v18  ;;  %v1957_v20 = vunpack.c.h.bf16 %v1975_v18 }
  0x32   :  { %2180 = vmatmul.mubr.msk.f32.gmra.mxu1 %vm48_vm0, %v1925_v49 }
  0x33   :  { %2182 = vmatprep.mubr.msk.f32.mxu1 %vm48_vm0, %v1928_v51 }
  0x36   :  { %474 = vmatmul.mubr.bf16.gmra.mxu0 %v2286_v21  ;;  %2183 = vmatmul.mubr.msk.f32.gmra.mxu1 %vm48_vm0, %v1929_v53  ;;  %v1976_v21 = vld [vmem:[%s3066_s2 + $0x78] sm:$0xff]  }
  0x37   :  { %481 = vmatprep.mubr.bf16.mxu0 %v2287_v24  ;;  %2185 = vmatprep.mubr.msk.f32.mxu1 %vm48_vm0, %v1932_v54  ;;  %v1960_v22 = vunpack.c.l.bf16 %v1976_v21  ;;  %v1961_v24 = vunpack.c.h.bf16 %v1976_v21  ;;  %v84_v53 = vld [vmem:[#allocation2 + $0x18] sm:$0xff] }
  0x3a   :  { %2186 = vmatmul.mubr.msk.f32.gmra.mxu1 %vm48_vm0, %v1933_v57 }
  0x3b   :  { %2188 = vmatprep.mubr.msk.f32.mxu1 %vm48_vm0, %v1936_v59  ;;  %v85_v59 = vld [vmem:[#allocation2 + $0x20] sm:$0xff] }
  0x3e   :  { %482 = vmatmul.mubr.bf16.gmra.mxu0 %v2289_v32  ;;  %2189 = vmatmul.mubr.msk.f32.gmra.mxu1 %vm48_vm0, %v1937_v61  ;;  %v2322_v32 = vld [vmem:[%s3064_s0 + $0xd0] ss:$8 sps:$4 sm:$0xff]  }
  0x3f   :  { %489 = vmatprep.mubr.bf16.mxu0 %v2290_v34  ;;  %2191 = vmatprep.mubr.msk.f32.mxu1 %vm48_vm0, %v1940_v62  ;;  %v2325_v34 = vld [vmem:[%s3064_s0 + $0xe0] ss:$8 sps:$4 sm:$0xff]  }
  0x42   :  { %2192 = vmatmul.mubr.msk.f32.gmra.mxu1 %vm48_vm0, %v1941_v1  ;;  %v86_v1 = vld [vmem:[#allocation2 + $0x28] sm:$0xff] }
  0x43   :  { %2194 = vmatprep.mubr.msk.f32.mxu1 %vm48_vm0, %v1944_v3 }
  0x46   :  { %490 = vmatmul.mubr.bf16.gmra.mxu0 %v2292_v40  ;;  %2195 = vmatmul.mubr.msk.f32.gmra.mxu1 %vm48_vm0, %v1945_v4 }
  0x47   :  { %497 = vmatprep.mubr.bf16.mxu0 %v2293_v42  ;;  %2197 = vmatprep.mubr.msk.f32.mxu1 %vm48_vm0, %v1948_v11 }
  0x4a   :  { %2198 = vmatmul.mubr.msk.f32.gmra.mxu1 %vm48_vm0, %v1949_v12 }
  0x4b   :  { %2200 = vmatprep.mubr.msk.f32.mxu1 %vm48_vm0, %v1952_v14 }
  0x4e   :  { %498 = vmatmul.mubr.bf16.gmra.mxu0 %v2295_v48  ;;  %2201 = vmatmul.mubr.msk.f32.gmra.mxu1 %vm48_vm0, %v1953_v16  ;;  %v83_v48 = vld [vmem:[#allocation2 + $0x10] sm:$0xff] }
  0x4f   :  { %505 = vmatprep.mubr.bf16.mxu0 %v2296_v50  ;;  %2203 = vmatprep.mubr.msk.f32.mxu1 %vm48_vm0, %v1956_v19  ;;  %v89_v19 = vld [vmem:[#allocation2 + $0x40] sm:$0xff] }
  0x52   :  { %2204 = vmatmul.mubr.msk.f32.gmra.mxu1 %vm48_vm0, %v1957_v20 }
  0x53   :  { %2206 = vmatprep.mubr.msk.f32.mxu1 %vm48_vm0, %v1960_v22 }
  0x56   :  { %506 = vmatmul.mubr.bf16.gmra.mxu0 %v2298_v56  ;;  %2207 = vmatmul.mubr.msk.f32.gmra.mxu1 %vm48_vm0, %v1961_v24 }
  0x57   :  { %513 = vmatprep.mubr.bf16.mxu0 %v2299_v58 }
  0x5e   :  { %514 = vmatmul.mubr.bf16.gmra.mxu0 %v2301_v0 }
  0x5f   :  { %521 = vmatprep.mubr.bf16.mxu0 %v2302_v2 }
  0x66   :  { %522 = vmatmul.mubr.bf16.gmra.mxu0 %v2304_v5 }
  0x67   :  { %529 = vmatprep.mubr.bf16.mxu0 %v2305_v6 }
  0x6e   :  { %530 = vmatmul.mubr.bf16.gmra.mxu0 %v2307_v7  ;;  %v87_v7 = vld [vmem:[#allocation2 + $0x30] sm:$0xff] }
  0x6f   :  { %537 = vmatprep.mubr.bf16.mxu0 %v2308_v8 }
  0x76   :  { %538 = vmatmul.mubr.bf16.gmra.mxu0 %v2310_v15 }
  0x77   :  { %545 = vmatprep.mubr.bf16.mxu0 %v2311_v17 }
  0x7e   :  { %546 = vmatmul.mubr.bf16.gmra.mxu0 %v2313_v23 }
  0x7f   :  { %553 = vmatprep.mubr.bf16.mxu0 %v2314_v25  ;;  %v90_v25 = vld [vmem:[#allocation2 + $0x48] sm:$0xff] }
  0x86   :  { %554 = vmatmul.mubr.bf16.gmra.mxu0 %v2316_v28 }
  0x87   :  { %561 = vmatprep.mubr.bf16.mxu0 %v2317_v29 }
  0x8e   :  { %562 = vmatmul.mubr.bf16.gmra.mxu0 %v2319_v30 }
  0x8f   :  { %569 = vmatprep.mubr.bf16.mxu0 %v2320_v31  ;;  %v91_v31 = vld [vmem:[#allocation2 + $0x50] sm:$0xff] }
  0x96   :  { %570 = vmatmul.mubr.bf16.gmra.mxu0 %v2322_v32 }
  0x97   :  { %577 = vmatprep.mubr.bf16.mxu0 %v2323_v33 }
  0x9e   :  { %578 = vmatmul.mubr.bf16.gmra.mxu0 %v2325_v34 }
  0x9f   :  { %585 = vmatprep.mubr.bf16.mxu0 %v2326_v35 }
  0xa6   :  { %586 = vmatmul.mubr.bf16.gmra.mxu0 %v2328_v36 }
  0xee   :  { %v1993_v37 = vpop.f32.mrf.mxu0 }
  0xf0   :  { %v1994_v39 = vpop.f32.mrf.mxu0 }
  0xf1   :  { %v1995_v40 = vadd.f32 %v1994_v39, %v1993_v37  ;;  %v92_v37 = vld [vmem:[#allocation2 + $0x58] sm:$0xff] }
  0xf2   :  { %v1996_v41 = vpop.f32.mrf.mxu0 }
  0xf3   :  { %v594_v42 = vadd.f32 %v1995_v40, %v81_v38 }
  0xf4   :  { %v1997_v44 = vpop.f32.mrf.mxu0 }
  0xf5   :  { %627 = vst.msk [vmem:[#allocation2] sm:$0xff] %vm48_vm0, %v594_v42  ;;  %v1998_v45 = vadd.f32 %v1997_v44, %v1996_v41 }
  0xf6   :  { %v1999_v46 = vpop.f32.mrf.mxu0 }
  0xf7   :  { %v595_v47 = vadd.f32 %v1998_v45, %v82_v43  ;;  %v93_v43 = vld [vmem:[#allocation2 + $0x60] sm:$0xff] }
  0xf8   :  { %v2000_v49 = vpop.f32.mrf.mxu0 }
  0xf9   :  { %628 = vst.msk [vmem:[#allocation2 + $0x8] sm:$0xff] %vm48_vm0, %v595_v47  ;;  %v2001_v50 = vadd.f32 %v2000_v49, %v1999_v46  ;;  %v94_v49 = vld [vmem:[#allocation2 + $0x68] sm:$0xff] }
  0xfa   :  { %v2002_v51 = vpop.f32.mrf.mxu0 }
  0xfb   :  { %v596_v52 = vadd.f32 %v2001_v50, %v83_v48 }
  0xfc   :  { %v2003_v54 = vpop.f32.mrf.mxu0  ;;  %v662_v55 = vld [vmem:[#allocation2] sm:$0xff] }
  0xfd   :  { %629 = vst.msk [vmem:[#allocation2 + $0x10] sm:$0xff] %vm48_vm0, %v596_v52  ;;  %v2004_v56 = vadd.f32 %v2003_v54, %v2002_v51  ;;  %2213 = vmatprep.mubr.msk.f32.mxu1 %vm48_vm0, %v662_v55  ;;  %v95_v55 = vld [vmem:[#allocation2 + $0x70] sm:$0xff] }
  0xfe   :  { %v2005_v57 = vpop.f32.mrf.mxu0 }
  0xff   :  { %v597_v58 = vadd.f32 %v2004_v56, %v84_v53 }
 0x100   :  { %v2006_v60 = vpop.f32.mrf.mxu0  ;;  %v663_v61 = vld [vmem:[#allocation2 + $0x8] sm:$0xff] }
 0x101   :  { %630 = vst.msk [vmem:[#allocation2 + $0x18] sm:$0xff] %vm48_vm0, %v597_v58  ;;  %v2007_v62 = vadd.f32 %v2006_v60, %v2005_v57  ;;  %2214 = vmatmul.mubr.msk.f32.vlgmr.msra.gmra.mxu1 %vm48_vm0, %v663_v61  ;;  %v96_v61 = vld [vmem:[#allocation2 + $0x78] sm:$0xff] }
 0x102   :  { %v2008_v63 = vpop.f32.mrf.mxu0 }
 0x103   :  { %v598_v0 = vadd.f32 %v2007_v62, %v85_v59 }
 0x104   :  { %v2009_v2 = vpop.f32.mrf.mxu0  ;;  %v664_v3 = vld [vmem:[#allocation2 + $0x10] sm:$0xff] }
 0x105   :  { %631 = vst.msk [vmem:[#allocation2 + $0x20] sm:$0xff] %vm48_vm0, %v598_v0  ;;  %v2010_v4 = vadd.f32 %v2009_v2, %v2008_v63  ;;  %2216 = vmatprep.mubr.msk.f32.mxu1 %vm48_vm0, %v664_v3  ;;  %v97_v3 = vld [vmem:[#allocation2 + $0x80] sm:$0xff] }
 0x106   :  { %v2011_v5 = vpop.f32.mrf.mxu0 }
 0x107   :  { %v599_v6 = vadd.f32 %v2010_v4, %v86_v1 }
 0x108   :  { %v2012_v8 = vpop.f32.mrf.mxu0  ;;  %v665_v9 = vld [vmem:[#allocation2 + $0x18] sm:$0xff] }
 0x109   :  { %632 = vst.msk [vmem:[#allocation2 + $0x28] sm:$0xff] %vm48_vm0, %v599_v6  ;;  %v2013_v10 = vadd.f32 %v2012_v8, %v2011_v5  ;;  %2217 = vmatmul.mubr.msk.f32.gmra.mxu1 %vm48_vm0, %v665_v9  ;;  %v98_v9 = vld [vmem:[#allocation2 + $0x88] sm:$0xff] }
 0x10a   :  { %v2014_v11 = vpop.f32.mrf.mxu0 }
 0x10b   :  { %v600_v12 = vadd.f32 %v2013_v10, %v87_v7 }
 0x10c   :  { %v2015_v14 = vpop.f32.mrf.mxu0  ;;  %v666_v15 = vld [vmem:[#allocation2 + $0x20] sm:$0xff] }
 0x10d   :  { %633 = vst.msk [vmem:[#allocation2 + $0x30] sm:$0xff] %vm48_vm0, %v600_v12  ;;  %v2016_v16 = vadd.f32 %v2015_v14, %v2014_v11  ;;  %2219 = vmatprep.mubr.msk.f32.mxu1 %vm48_vm0, %v666_v15  ;;  %v99_v15 = vld [vmem:[#allocation2 + $0x90] sm:$0xff] }
 0x10e   :  { %v2017_v17 = vpop.f32.mrf.mxu0 }
 0x10f   :  { %v601_v18 = vadd.f32 %v2016_v16, %v88_v13 }
 0x110   :  { %v2018_v20 = vpop.f32.mrf.mxu0  ;;  %v667_v21 = vld [vmem:[#allocation2 + $0x28] sm:$0xff] }
 0x111   :  { %634 = vst.msk [vmem:[#allocation2 + $0x38] sm:$0xff] %vm48_vm0, %v601_v18  ;;  %v2019_v22 = vadd.f32 %v2018_v20, %v2017_v17  ;;  %2220 = vmatmul.mubr.msk.f32.gmra.mxu1 %vm48_vm0, %v667_v21  ;;  %v100_v21 = vld [vmem:[#allocation2 + $0x98] sm:$0xff] }
 0x112   :  { %v2020_v23 = vpop.f32.mrf.mxu0 }
 0x113   :  { %v602_v24 = vadd.f32 %v2019_v22, %v89_v19 }
 0x114   :  { %v2021_v26 = vpop.f32.mrf.mxu0  ;;  %v668_v27 = vld [vmem:[#allocation2 + $0x30] sm:$0xff] }
 0x115   :  { %635 = vst.msk [vmem:[#allocation2 + $0x40] sm:$0xff] %vm48_vm0, %v602_v24  ;;  %v2022_v28 = vadd.f32 %v2021_v26, %v2020_v23  ;;  %2222 = vmatprep.mubr.msk.f32.mxu1 %vm48_vm0, %v668_v27  ;;  %v101_v27 = vld [vmem:[#allocation2 + $0xa0] sm:$0xff] }
 0x116   :  { %v2023_v29 = vpop.f32.mrf.mxu0 }
 0x117   :  { %v603_v30 = vadd.f32 %v2022_v28, %v90_v25 }
 0x118   :  { %v2024_v32 = vpop.f32.mrf.mxu0  ;;  %v669_v33 = vld [vmem:[#allocation2 + $0x38] sm:$0xff] }
 0x119   :  { %636 = vst.msk [vmem:[#allocation2 + $0x48] sm:$0xff] %vm48_vm0, %v603_v30  ;;  %v2025_v34 = vadd.f32 %v2024_v32, %v2023_v29  ;;  %2223 = vmatmul.mubr.msk.f32.gmra.mxu1 %vm48_vm0, %v669_v33 }
 0x11a   :  { %v2026_v35 = vpop.f32.mrf.mxu0 }
 0x11b   :  { %v604_v36 = vadd.f32 %v2025_v34, %v91_v31  ;;  %v2703_v31 = vpop.f32.mrf.mxu1  ;;  %v102_v34 = vld [vmem:[#allocation2 + $0xa8] sm:$0xff] }
 0x11c   :  { %v2027_v38 = vpop.f32.mrf.mxu0  ;;  %v670_v39 = vld [vmem:[#allocation2 + $0x40] sm:$0xff] }
 0x11d   :  { %637 = vst.msk [vmem:[#allocation2 + $0x50] sm:$0xff] %vm48_vm0, %v604_v36  ;;  %v2028_v40 = vadd.f32 %v2027_v38, %v2026_v35  ;;  %2225 = vmatprep.mubr.msk.f32.mxu1 %vm48_vm0, %v670_v39  ;;  %v2707_v38 = vpop.f32.mrf.mxu1 }
 0x11e   :  { %v2029_v41 = vpop.f32.mrf.mxu0 }
 0x11f   :  { %v605_v42 = vadd.f32 %v2028_v40, %v92_v37 }
 0x120   :  { %v2030_v44 = vpop.f32.mrf.mxu0  ;;  %v671_v45 = vld [vmem:[#allocation2 + $0x48] sm:$0xff] }
 0x121   :  { %638 = vst.msk [vmem:[#allocation2 + $0x58] sm:$0xff] %vm48_vm0, %v605_v42  ;;  %v2031_v46 = vadd.f32 %v2030_v44, %v2029_v41  ;;  %2226 = vmatmul.mubr.msk.f32.gmra.mxu1 %vm48_vm0, %v671_v45  ;;  %v103_v41 = vld [vmem:[#allocation2 + $0xb0] sm:$0xff]  ;;  %v2711_v45 = vpop.f32.mrf.mxu1 }
 0x122   :  { %v2032_v47 = vpop.f32.mrf.mxu0 }
 0x123   :  { %v606_v48 = vadd.f32 %v2031_v46, %v93_v43 }
 0x124   :  { %v2033_v50 = vpop.f32.mrf.mxu0  ;;  %v672_v51 = vld [vmem:[#allocation2 + $0x50] sm:$0xff] }
 0x125   :  { %639 = vst.msk [vmem:[#allocation2 + $0x60] sm:$0xff] %vm48_vm0, %v606_v48  ;;  %v2034_v52 = vadd.f32 %v2033_v50, %v2032_v47  ;;  %2228 = vmatprep.mubr.msk.f32.mxu1 %vm48_vm0, %v672_v51  ;;  %v104_v48 = vld [vmem:[#allocation2 + $0xb8] sm:$0xff] }
 0x126   :  { %v2035_v53 = vpop.f32.mrf.mxu0 }
 0x127   :  { %v607_v54 = vadd.f32 %v2034_v52, %v94_v49  ;;  %v2715_v52 = vpop.f32.mrf.mxu1 }
 0x128   :  { %v2036_v56 = vpop.f32.mrf.mxu0  ;;  %v673_v57 = vld [vmem:[#allocation2 + $0x58] sm:$0xff] }
 0x129   :  { %640 = vst.msk [vmem:[#allocation2 + $0x68] sm:$0xff] %vm48_vm0, %v607_v54  ;;  %v2037_v58 = vadd.f32 %v2036_v56, %v2035_v53  ;;  %2229 = vmatmul.mubr.msk.f32.gmra.mxu1 %vm48_vm0, %v673_v57 }
 0x12a   :  { %v2038_v59 = vpop.f32.mrf.mxu0 }
 0x12b   :  { %v608_v60 = vadd.f32 %v2037_v58, %v95_v55  ;;  %v105_v55 = vld [vmem:[#allocation2 + $0xc0] sm:$0xff] }
 0x12c   :  { %v2039_v62 = vpop.f32.mrf.mxu0  ;;  %v674_v63 = vld [vmem:[#allocation2 + $0x60] sm:$0xff] }
 0x12d   :  { %641 = vst.msk [vmem:[#allocation2 + $0x70] sm:$0xff] %vm48_vm0, %v608_v60  ;;  %v2040_v0 = vadd.f32 %v2039_v62, %v2038_v59  ;;  %2231 = vmatprep.mubr.msk.f32.mxu1 %vm48_vm0, %v674_v63  ;;  %v2719_v59 = vpop.f32.mrf.mxu1  ;;  %v106_v62 = vld [vmem:[#allocation2 + $0xc8] sm:$0xff] }
 0x12e   :  { %v2041_v1 = vpop.f32.mrf.mxu0 }
 0x12f   :  { %v609_v2 = vadd.f32 %v2040_v0, %v96_v61 }
 0x130   :  { %v2042_v4 = vpop.f32.mrf.mxu0  ;;  %v675_v5 = vld [vmem:[#allocation2 + $0x68] sm:$0xff] }
 0x131   :  { %642 = vst.msk [vmem:[#allocation2 + $0x78] sm:$0xff] %vm48_vm0, %v609_v2  ;;  %v2043_v6 = vadd.f32 %v2042_v4, %v2041_v1  ;;  %2232 = vmatmul.mubr.msk.f32.gmra.mxu1 %vm48_vm0, %v675_v5  ;;  %v2723_v2 = vpop.f32.mrf.mxu1  ;;  %v107_v5 = vld [vmem:[#allocation2 + $0xd0] sm:$0xff] }
 0x132   :  { %v2044_v7 = vpop.f32.mrf.mxu0 }
 0x133   :  { %v610_v8 = vadd.f32 %v2043_v6, %v97_v3 }
 0x134   :  { %v2045_v10 = vpop.f32.mrf.mxu0  ;;  %v676_v11 = vld [vmem:[#allocation2 + $0x70] sm:$0xff] }
 0x135   :  { %643 = vst.msk [vmem:[#allocation2 + $0x80] sm:$0xff] %vm48_vm0, %v610_v8  ;;  %v2046_v12 = vadd.f32 %v2045_v10, %v2044_v7  ;;  %2234 = vmatprep.mubr.msk.f32.mxu1 %vm48_vm0, %v676_v11 }
 0x136   :  { %v2047_v13 = vpop.f32.mrf.mxu0 }
 0x137   :  { %v611_v14 = vadd.f32 %v2046_v12, %v98_v9  ;;  %v2727_v9 = vpop.f32.mrf.mxu1  ;;  %v108_v12 = vld [vmem:[#allocation2 + $0xd8] sm:$0xff] }
 0x138   :  { %v2048_v16 = vpop.f32.mrf.mxu0  ;;  %v677_v17 = vld [vmem:[#allocation2 + $0x78] sm:$0xff] }
 0x139   :  { %644 = vst.msk [vmem:[#allocation2 + $0x88] sm:$0xff] %vm48_vm0, %v611_v14  ;;  %v2049_v18 = vadd.f32 %v2048_v16, %v2047_v13  ;;  %2235 = vmatmul.mubr.msk.f32.gmra.mxu1 %vm48_vm0, %v677_v17  ;;  %v2731_v16 = vpop.f32.mrf.mxu1 }
 0x13a   :  { %v2050_v19 = vpop.f32.mrf.mxu0 }
 0x13b   :  { %v612_v20 = vadd.f32 %v2049_v18, %v99_v15 }
 0x13c   :  { %v2051_v22 = vpop.f32.mrf.mxu0  ;;  %v678_v23 = vld [vmem:[#allocation2 + $0x80] sm:$0xff] }
 0x13d   :  { %645 = vst.msk [vmem:[#allocation2 + $0x90] sm:$0xff] %vm48_vm0, %v612_v20  ;;  %v2052_v24 = vadd.f32 %v2051_v22, %v2050_v19  ;;  %2237 = vmatprep.mubr.msk.f32.mxu1 %vm48_vm0, %v678_v23  ;;  %v109_v19 = vld [vmem:[#allocation2 + $0xe0] sm:$0xff]  ;;  %v2735_v23 = vpop.f32.mrf.mxu1 }
 0x13e   :  { %v2053_v25 = vpop.f32.mrf.mxu0 }
 0x13f   :  { %v613_v26 = vadd.f32 %v2052_v24, %v100_v21 }
 0x140   :  { %v2054_v28 = vpop.f32.mrf.mxu0  ;;  %v679_v29 = vld [vmem:[#allocation2 + $0x88] sm:$0xff] }
 0x141   :  { %646 = vst.msk [vmem:[#allocation2 + $0x98] sm:$0xff] %vm48_vm0, %v613_v26  ;;  %v2055_v30 = vadd.f32 %v2054_v28, %v2053_v25  ;;  %2238 = vmatmul.mubr.msk.f32.gmra.mxu1 %vm48_vm0, %v679_v29  ;;  %v110_v26 = vld [vmem:[#allocation2 + $0xe8] sm:$0xff] }
 0x142   :  { %v2056_v32 = vpop.f32.mrf.mxu0 }
 0x143   :  { %v614_v33 = vadd.f32 %v2055_v30, %v101_v27  ;;  %v2739_v30 = vpop.f32.mrf.mxu1 }
 0x144   :  { %v2057_v35 = vpop.f32.mrf.mxu0  ;;  %v680_v36 = vld [vmem:[#allocation2 + $0x90] sm:$0xff] }
 0x145   :  { %647 = vst.msk [vmem:[#allocation2 + $0xa0] sm:$0xff] %vm48_vm0, %v614_v33  ;;  %v2058_v37 = vadd.f32 %v2057_v35, %v2056_v32  ;;  %2240 = vmatprep.mubr.msk.f32.mxu1 %vm48_vm0, %v680_v36 }
 0x146   :  { %v2059_v39 = vpop.f32.mrf.mxu0 }
 0x147   :  { %v615_v40 = vadd.f32 %v2058_v37, %v102_v34  ;;  %v111_v34 = vld [vmem:[#allocation2 + $0xf0] sm:$0xff] }
 0x148   :  { %v2060_v42 = vpop.f32.mrf.mxu0  ;;  %v681_v43 = vld [vmem:[#allocation2 + $0x98] sm:$0xff] }
 0x149   :  { %648 = vst.msk [vmem:[#allocation2 + $0xa8] sm:$0xff] %vm48_vm0, %v615_v40  ;;  %v2061_v44 = vadd.f32 %v2060_v42, %v2059_v39  ;;  %2241 = vmatmul.mubr.msk.f32.gmra.mxu1 %vm48_vm0, %v681_v43  ;;  %v2743_v39 = vpop.f32.mrf.mxu1  ;;  %v112_v42 = vld [vmem:[#allocation2 + $0xf8] sm:$0xff] }
 0x14a   :  { %v2062_v46 = vpop.f32.mrf.mxu0 }
 0x14b   :  { %v616_v47 = vadd.f32 %v2061_v44, %v103_v41 }
 0x14c   :  { %v2063_v49 = vpop.f32.mrf.mxu0  ;;  %v682_v50 = vld [vmem:[#allocation2 + $0xa0] sm:$0xff] }
 0x14d   :  { %649 = vst.msk [vmem:[#allocation2 + $0xb0] sm:$0xff] %vm48_vm0, %v616_v47  ;;  %v2064_v51 = vadd.f32 %v2063_v49, %v2062_v46  ;;  %2243 = vmatprep.mubr.msk.f32.mxu1 %vm48_vm0, %v682_v50  ;;  %v2747_v47 = vpop.f32.mrf.mxu1 }
 0x14e   :  { %v2065_v53 = vpop.f32.mrf.mxu0 }
 0x14f   :  { %v617_v54 = vadd.f32 %v2064_v51, %v104_v48  ;;  %v2751_v50 = vpop.f32.mrf.mxu1 }
 0x150   :  { %v2066_v56 = vpop.f32.mrf.mxu0  ;;  %v683_v57 = vld [vmem:[#allocation2 + $0xa8] sm:$0xff] }
 0x151   :  { %650 = vst.msk [vmem:[#allocation2 + $0xb8] sm:$0xff] %vm48_vm0, %v617_v54  ;;  %v2067_v58 = vadd.f32 %v2066_v56, %v2065_v53  ;;  %2244 = vmatmul.mubr.msk.f32.gmra.mxu1 %vm48_vm0, %v683_v57  ;;  %v2754_v53 = vpop.f32.mrf.mxu1 }
 0x152   :  { %v2068_v60 = vpop.f32.mrf.mxu0 }
 0x153   :  { %v618_v61 = vadd.f32 %v2067_v58, %v105_v55  ;;  %v2757_v55 = vpop.f32.mrf.mxu1 }
 0x154   :  { %v2069_v63 = vpop.f32.mrf.mxu0  ;;  %v684_v0 = vld [vmem:[#allocation2 + $0xb0] sm:$0xff] }
 0x155   :  { %651 = vst.msk [vmem:[#allocation2 + $0xc0] sm:$0xff] %vm48_vm0, %v618_v61  ;;  %v2070_v1 = vadd.f32 %v2069_v63, %v2068_v60  ;;  %2246 = vmatprep.mubr.msk.f32.mxu1 %vm48_vm0, %v684_v0  ;;  %v2759_v56 = vpop.f32.mrf.mxu1 }
 0x156   :  { %v2071_v3 = vpop.f32.mrf.mxu0 }
 0x157   :  { %v619_v4 = vadd.f32 %v2070_v1, %v106_v62  ;;  %v2761_v57 = vpop.f32.mrf.mxu1 }
 0x158   :  { %v2072_v6 = vpop.f32.mrf.mxu0  ;;  %v685_v7 = vld [vmem:[#allocation2 + $0xb8] sm:$0xff] }
 0x159   :  { %652 = vst.msk [vmem:[#allocation2 + $0xc8] sm:$0xff] %vm48_vm0, %v619_v4  ;;  %v2073_v8 = vadd.f32 %v2072_v6, %v2071_v3  ;;  %2247 = vmatmul.mubr.msk.f32.gmra.mxu1 %vm48_vm0, %v685_v7  ;;  %v2763_v58 = vpop.f32.mrf.mxu1 }
 0x15a   :  { %v2074_v10 = vpop.f32.mrf.mxu0 }
 0x15b   :  { %v620_v11 = vadd.f32 %v2073_v8, %v107_v5  ;;  %v2765_v60 = vpop.f32.mrf.mxu1 }
 0x15c   :  { %v2075_v13 = vpop.f32.mrf.mxu0  ;;  %v686_v14 = vld [vmem:[#allocation2 + $0xc0] sm:$0xff] }
 0x15d   :  { %653 = vst.msk [vmem:[#allocation2 + $0xd0] sm:$0xff] %vm48_vm0, %v620_v11  ;;  %v2076_v15 = vadd.f32 %v2075_v13, %v2074_v10  ;;  %2249 = vmatprep.mubr.msk.f32.mxu1 %vm48_vm0, %v686_v14  ;;  %v2767_v61 = vpop.f32.mrf.mxu1  ;;  %v2796_v13 = vld [vmem:[%s3069_s5] ss:$0 sm:$0xff] }
 0x15e   :  { %v2077_v17 = vpop.f32.mrf.mxu0 }
 0x15f   :  { %v621_v18 = vadd.f32 %v2076_v15, %v108_v12  ;;  %v2769_v62 = vpop.f32.mrf.mxu1 }
 0x160   :  { %v2078_v20 = vpop.f32.mrf.mxu0  ;;  %v687_v21 = vld [vmem:[#allocation2 + $0xc8] sm:$0xff] }
 0x161   :  { %654 = vst.msk [vmem:[#allocation2 + $0xd8] sm:$0xff] %vm48_vm0, %v621_v18  ;;  %v2079_v22 = vadd.f32 %v2078_v20, %v2077_v17  ;;  %2250 = vmatmul.mubr.msk.f32.gmra.mxu1 %vm48_vm0, %v687_v21  ;;  %v2771_v63 = vpop.f32.mrf.mxu1 }
 0x162   :  { %v2080_v24 = vpop.f32.mrf.mxu0 }
 0x163   :  { %v622_v25 = vadd.f32 %v2079_v22, %v109_v19  ;;  %v2773_v0 = vpop.f32.mrf.mxu1  ;;  %v2804_v19 = vld [vmem:[%s3070_s6] ss:$0 sm:$0xff] }
 0x164   :  { %v2081_v27 = vpop.f32.mrf.mxu0  ;;  %v688_v28 = vld [vmem:[#allocation2 + $0xd0] sm:$0xff]  ;;  %v2810_v22 = vld [vmem:[%s3071_s7] ss:$0 sm:$0xff] }
 0x165   :  { %655 = vst.msk [vmem:[#allocation2 + $0xe0] sm:$0xff] %vm48_vm0, %v622_v25  ;;  %v2082_v29 = vadd.f32 %v2081_v27, %v2080_v24  ;;  %2252 = vmatprep.mubr.msk.f32.mxu1 %vm48_vm0, %v688_v28  ;;  %v2775_v1 = vpop.f32.mrf.mxu1 }
 0x166   :  { %v2083_v32 = vpop.f32.mrf.mxu0 }
 0x167   :  { %v623_v33 = vadd.f32 %v2082_v29, %v110_v26  ;;  %v2777_v3 = vpop.f32.mrf.mxu1 }
 0x168   :  { %v2084_v35 = vpop.f32.mrf.mxu0  ;;  %v689_v36 = vld [vmem:[#allocation2 + $0xd8] sm:$0xff] }
 0x169   :  { %656 = vst.msk [vmem:[#allocation2 + $0xe8] sm:$0xff] %vm48_vm0, %v623_v33  ;;  %v2085_v37 = vadd.f32 %v2084_v35, %v2083_v32  ;;  %2253 = vmatmul.mubr.msk.f32.gmra.mxu1 %vm48_vm0, %v689_v36  ;;  %v2779_v4 = vpop.f32.mrf.mxu1 }
 0x16a   :  { %v2086_v40 = vpop.f32.mrf.mxu0 }
 0x16b   :  { %v624_v41 = vadd.f32 %v2085_v37, %v111_v34  ;;  %v2781_v5 = vpop.f32.mrf.mxu1 }
 0x16c   :  { %v2087_v43 = vpop.f32.mrf.mxu0  ;;  %v690_v44 = vld [vmem:[#allocation2 + $0xe0] sm:$0xff] }
 0x16d   :  { %657 = vst.msk [vmem:[#allocation2 + $0xf0] sm:$0xff] %vm48_vm0, %v624_v41  ;;  %v2088_v46 = vadd.f32 %v2087_v43, %v2086_v40  ;;  %2255 = vmatprep.mubr.msk.f32.mxu1 %vm48_vm0, %v690_v44  ;;  %v2783_v6 = vpop.f32.mrf.mxu1 }
 0x16f   :  { %v625_v48 = vadd.f32 %v2088_v46, %v112_v42  ;;  %v2785_v7 = vpop.f32.mrf.mxu1 }
 0x170   :  { %v691_v49 = vld [vmem:[#allocation2 + $0xe8] sm:$0xff] }
 0x171   :  { %658 = vst.msk [vmem:[#allocation2 + $0xf8] sm:$0xff] %vm48_vm0, %v625_v48  ;;  %2256 = vmatmul.mubr.msk.f32.gmra.mxu1 %vm48_vm0, %v691_v49  ;;  %v2787_v8 = vpop.f32.mrf.mxu1 }
 0x173   :  { %v2789_v10 = vpop.f32.mrf.mxu1 }
 0x174   :  { %v692_v51 = vld [vmem:[#allocation2 + $0xf0] sm:$0xff] }
 0x175   :  { %2258 = vmatprep.mubr.msk.f32.mxu1 %vm48_vm0, %v692_v51  ;;  %v2791_v11 = vpop.f32.mrf.mxu1 }
 0x178   :  { %v693_v54 = vld [vmem:[#allocation2 + $0xf8] sm:$0xff] }
 0x179   :  { %2259 = vmatmul.mubr.msk.f32.gmra.mxu1 %vm48_vm0, %v693_v54 }
 0x1c1   :  { %v2215_v12 = vpop.f32.mrf.mxu1 }
 0x1c2   :  { %v1251_v14 = vadd.f32 %v2215_v12, %v2703_v31 }
 0x1c3   :  { %v1245_v15 = vpop.f32.mrf.mxu1 }
 0x1c4   :  { %v1412_v17 = vadd.f32 %v2796_v13, %v1251_v14  ;;  %v1246_v18 = vadd.f32 %v1245_v15, %v2707_v38 }
 0x1c6   :  { %v1444_v20 = vmax.f32 %v1412_v17, 0.0  ;;  %v1411_v21 = vadd.f32 %v2796_v13, %v1246_v18 }
 0x1c8   :  { %v1483_v31 = vmul.f32 %v2804_v19, %v1444_v20  ;;  %v1443_v24 = vmax.f32 %v1411_v21, 0.0 }
 0x1c9   :  { %v2218_v25 = vpop.f32.mrf.mxu1 }
 0x1ca   :  { %v1522_v26 = vadd.f32 %v2810_v22, %v1483_v31  ;;  %v1482_v38 = vmul.f32 %v2804_v19, %v1443_v24  ;;  %v1261_v27 = vadd.f32 %v2218_v25, %v2711_v45 }
 0x1cb   :  { %v1255_v28 = vpop.f32.mrf.mxu1 }
 0x1cc   :  { %v1867_v29 = vpack.c.bf16 %v1522_v26, %v1522_v26  ;;  %v1521_v32 = vadd.f32 %v2810_v22, %v1482_v38  ;;  %v1414_v33 = vadd.f32 %v2796_v13, %v1261_v27  ;;  %v1256_v34 = vadd.f32 %v1255_v28, %v2715_v52 }
 0x1ce   :  { %1683 = vst.msk [vmem:[%s3072_s8 + $0x4] sm:$0xf] %vm1681_vm1, %v1867_v29  ;;  %v1866_v35 = vpack.c.bf16 %v1521_v32, %v1521_v32  ;;  %v1446_v36 = vmax.f32 %v1414_v33, 0.0  ;;  %v1413_v37 = vadd.f32 %v2796_v13, %v1256_v34 }
 0x1d0   :  { %1682 = vst.msk [vmem:[%s3072_s8] sm:$0xf] %vm1681_vm1, %v1866_v35  ;;  %v1485_v45 = vmul.f32 %v2804_v19, %v1446_v36  ;;  %v1445_v40 = vmax.f32 %v1413_v37, 0.0 }
 0x1d1   :  { %v2221_v41 = vpop.f32.mrf.mxu1 }
 0x1d2   :  { %v1524_v52 = vadd.f32 %v2810_v22, %v1485_v45  ;;  %v1484_v42 = vmul.f32 %v2804_v19, %v1445_v40  ;;  %v1271_v43 = vadd.f32 %v2221_v41, %v2719_v59 }
 0x1d3   :  { %v1265_v44 = vpop.f32.mrf.mxu1 }
 0x1d4   :  { %v1869_v46 = vpack.c.bf16 %v1524_v52, %v1524_v52  ;;  %v1523_v48 = vadd.f32 %v2810_v22, %v1484_v42  ;;  %v1416_v49 = vadd.f32 %v2796_v13, %v1271_v43  ;;  %v1266_v51 = vadd.f32 %v1265_v44, %v2723_v2 }
 0x1d6   :  { %1685 = vst.msk [vmem:[%s3072_s8 + $0xc] sm:$0xf] %vm1681_vm1, %v1869_v46  ;;  %v1868_v54 = vpack.c.bf16 %v1523_v48, %v1523_v48  ;;  %v1448_v12 = vmax.f32 %v1416_v49, 0.0  ;;  %v1415_v14 = vadd.f32 %v2796_v13, %v1266_v51 }
 0x1d8   :  { %1684 = vst.msk [vmem:[%s3072_s8 + $0x8] sm:$0xf] %vm1681_vm1, %v1868_v54  ;;  %v1487_v59 = vmul.f32 %v2804_v19, %v1448_v12  ;;  %v1447_v15 = vmax.f32 %v1415_v14, 0.0 }
 0x1d9   :  { %v2224_v17 = vpop.f32.mrf.mxu1 }
 0x1da   :  { %v1526_v2 = vadd.f32 %v2810_v22, %v1487_v59  ;;  %v1486_v18 = vmul.f32 %v2804_v19, %v1447_v15  ;;  %v1281_v20 = vadd.f32 %v2224_v17, %v2727_v9 }
 0x1db   :  { %v1275_v21 = vpop.f32.mrf.mxu1 }
 0x1dc   :  { %v1871_v31 = vpack.c.bf16 %v1526_v2, %v1526_v2  ;;  %v1525_v24 = vadd.f32 %v2810_v22, %v1486_v18  ;;  %v1418_v25 = vadd.f32 %v2796_v13, %v1281_v20  ;;  %v1276_v26 = vadd.f32 %v1275_v21, %v2731_v16 }
 0x1de   :  { %1687 = vst.msk [vmem:[%s3072_s8 + $0x14] sm:$0xf] %vm1681_vm1, %v1871_v31  ;;  %v1870_v38 = vpack.c.bf16 %v1525_v24, %v1525_v24  ;;  %v1450_v27 = vmax.f32 %v1418_v25, 0.0  ;;  %v1417_v28 = vadd.f32 %v2796_v13, %v1276_v26 }
 0x1e0   :  { %1686 = vst.msk [vmem:[%s3072_s8 + $0x10] sm:$0xf] %vm1681_vm1, %v1870_v38  ;;  %v1489_v9 = vmul.f32 %v2804_v19, %v1450_v27  ;;  %v1449_v29 = vmax.f32 %v1417_v28, 0.0 }
 0x1e1   :  { %v2227_v32 = vpop.f32.mrf.mxu1 }
 0x1e2   :  { %v1528_v16 = vadd.f32 %v2810_v22, %v1489_v9  ;;  %v1488_v33 = vmul.f32 %v2804_v19, %v1449_v29  ;;  %v1291_v34 = vadd.f32 %v2227_v32, %v2735_v23 }
 0x1e3   :  { %v1285_v35 = vpop.f32.mrf.mxu1 }
 0x1e4   :  { %v1873_v36 = vpack.c.bf16 %v1528_v16, %v1528_v16  ;;  %v1527_v37 = vadd.f32 %v2810_v22, %v1488_v33  ;;  %v1420_v45 = vadd.f32 %v2796_v13, %v1291_v34  ;;  %v1286_v40 = vadd.f32 %v1285_v35, %v2739_v30 }
 0x1e6   :  { %1689 = vst.msk [vmem:[%s3072_s8 + $0x1c] sm:$0xf] %vm1681_vm1, %v1873_v36  ;;  %v1872_v41 = vpack.c.bf16 %v1527_v37, %v1527_v37  ;;  %v1452_v52 = vmax.f32 %v1420_v45, 0.0  ;;  %v1419_v42 = vadd.f32 %v2796_v13, %v1286_v40 }
 0x1e8   :  { %1688 = vst.msk [vmem:[%s3072_s8 + $0x18] sm:$0xf] %vm1681_vm1, %v1872_v41  ;;  %v1491_v23 = vmul.f32 %v2804_v19, %v1452_v52  ;;  %v1451_v43 = vmax.f32 %v1419_v42, 0.0 }
 0x1e9   :  { %v2230_v44 = vpop.f32.mrf.mxu1 }
 0x1ea   :  { %v1530_v30 = vadd.f32 %v2810_v22, %v1491_v23  ;;  %v1490_v46 = vmul.f32 %v2804_v19, %v1451_v43  ;;  %v1301_v48 = vadd.f32 %v2230_v44, %v2743_v39 }
 0x1eb   :  { %v1295_v49 = vpop.f32.mrf.mxu1 }
 0x1ec   :  { %v1875_v51 = vpack.c.bf16 %v1530_v30, %v1530_v30  ;;  %v1529_v54 = vadd.f32 %v2810_v22, %v1490_v46  ;;  %v1422_v12 = vadd.f32 %v2796_v13, %v1301_v48  ;;  %v1296_v14 = vadd.f32 %v1295_v49, %v2747_v47 }
 0x1ee   :  { %1691 = vst.msk [vmem:[%s3072_s8 + $0x24] sm:$0xf] %vm1681_vm1, %v1875_v51  ;;  %v1874_v59 = vpack.c.bf16 %v1529_v54, %v1529_v54  ;;  %v1454_v15 = vmax.f32 %v1422_v12, 0.0  ;;  %v1421_v17 = vadd.f32 %v2796_v13, %v1296_v14 }
 0x1f0   :  { %1690 = vst.msk [vmem:[%s3072_s8 + $0x20] sm:$0xf] %vm1681_vm1, %v1874_v59  ;;  %v1493_v39 = vmul.f32 %v2804_v19, %v1454_v15  ;;  %v1453_v2 = vmax.f32 %v1421_v17, 0.0 }
 0x1f1   :  { %v2233_v18 = vpop.f32.mrf.mxu1 }
 0x1f2   :  { %v1532_v47 = vadd.f32 %v2810_v22, %v1493_v39  ;;  %v1492_v20 = vmul.f32 %v2804_v19, %v1453_v2  ;;  %v1311_v21 = vadd.f32 %v2233_v18, %v2751_v50 }
 0x1f3   :  { %v1305_v31 = vpop.f32.mrf.mxu1 }
 0x1f4   :  { %v1877_v24 = vpack.c.bf16 %v1532_v47, %v1532_v47  ;;  %v1531_v25 = vadd.f32 %v2810_v22, %v1492_v20  ;;  %v1424_v26 = vadd.f32 %v2796_v13, %v1311_v21  ;;  %v1306_v38 = vadd.f32 %v1305_v31, %v2754_v53 }
 0x1f6   :  { %1693 = vst.msk [vmem:[%s3072_s8 + $0x2c] sm:$0xf] %vm1681_vm1, %v1877_v24  ;;  %v1876_v27 = vpack.c.bf16 %v1531_v25, %v1531_v25  ;;  %v1456_v28 = vmax.f32 %v1424_v26, 0.0  ;;  %v1423_v9 = vadd.f32 %v2796_v13, %v1306_v38 }
 0x1f8   :  { %1692 = vst.msk [vmem:[%s3072_s8 + $0x28] sm:$0xf] %vm1681_vm1, %v1876_v27  ;;  %v1495_v50 = vmul.f32 %v2804_v19, %v1456_v28  ;;  %v1455_v29 = vmax.f32 %v1423_v9, 0.0 }
 0x1f9   :  { %v2236_v32 = vpop.f32.mrf.mxu1 }
 0x1fa   :  { %v1534_v53 = vadd.f32 %v2810_v22, %v1495_v50  ;;  %v1494_v16 = vmul.f32 %v2804_v19, %v1455_v29  ;;  %v1321_v33 = vadd.f32 %v2236_v32, %v2757_v55 }
 0x1fb   :  { %v1315_v34 = vpop.f32.mrf.mxu1 }
 0x1fc   :  { %v1879_v35 = vpack.c.bf16 %v1534_v53, %v1534_v53  ;;  %v1533_v36 = vadd.f32 %v2810_v22, %v1494_v16  ;;  %v1426_v37 = vadd.f32 %v2796_v13, %v1321_v33  ;;  %v1316_v45 = vadd.f32 %v1315_v34, %v2759_v56 }
 0x1fe   :  { %1695 = vst.msk [vmem:[%s3072_s8 + $0x34] sm:$0xf] %vm1681_vm1, %v1879_v35  ;;  %v1878_v40 = vpack.c.bf16 %v1533_v36, %v1533_v36  ;;  %v1458_v41 = vmax.f32 %v1426_v37, 0.0  ;;  %v1425_v52 = vadd.f32 %v2796_v13, %v1316_v45 }
 0x200   :  { %1694 = vst.msk [vmem:[%s3072_s8 + $0x30] sm:$0xf] %vm1681_vm1, %v1878_v40  ;;  %v1497_v55 = vmul.f32 %v2804_v19, %v1458_v41  ;;  %v1457_v42 = vmax.f32 %v1425_v52, 0.0 }
 0x201   :  { %v2239_v23 = vpop.f32.mrf.mxu1 }
 0x202   :  { %v1536_v56 = vadd.f32 %v2810_v22, %v1497_v55  ;;  %v1496_v43 = vmul.f32 %v2804_v19, %v1457_v42  ;;  %v1331_v44 = vadd.f32 %v2239_v23, %v2761_v57 }
 0x203   :  { %v1325_v30 = vpop.f32.mrf.mxu1 }
 0x204   :  { %v1881_v46 = vpack.c.bf16 %v1536_v56, %v1536_v56  ;;  %v1535_v48 = vadd.f32 %v2810_v22, %v1496_v43  ;;  %v1428_v49 = vadd.f32 %v2796_v13, %v1331_v44  ;;  %v1326_v51 = vadd.f32 %v1325_v30, %v2763_v58 }
 0x206   :  { %1697 = vst.msk [vmem:[%s3072_s8 + $0x3c] sm:$0xf] %vm1681_vm1, %v1881_v46  ;;  %v1880_v54 = vpack.c.bf16 %v1535_v48, %v1535_v48  ;;  %v1460_v12 = vmax.f32 %v1428_v49, 0.0  ;;  %v1427_v14 = vadd.f32 %v2796_v13, %v1326_v51 }
 0x208   :  { %1696 = vst.msk [vmem:[%s3072_s8 + $0x38] sm:$0xf] %vm1681_vm1, %v1880_v54  ;;  %v1499_v57 = vmul.f32 %v2804_v19, %v1460_v12  ;;  %v1459_v59 = vmax.f32 %v1427_v14, 0.0 }
 0x209   :  { %v2242_v15 = vpop.f32.mrf.mxu1 }
 0x20a   :  { %v1538_v58 = vadd.f32 %v2810_v22, %v1499_v57  ;;  %v1498_v17 = vmul.f32 %v2804_v19, %v1459_v59  ;;  %v1341_v39 = vadd.f32 %v2242_v15, %v2765_v60 }
 0x20b   :  { %v1335_v2 = vpop.f32.mrf.mxu1 }
 0x20c   :  { %v1883_v18 = vpack.c.bf16 %v1538_v58, %v1538_v58  ;;  %v1537_v47 = vadd.f32 %v2810_v22, %v1498_v17  ;;  %v1430_v20 = vadd.f32 %v2796_v13, %v1341_v39  ;;  %v1336_v21 = vadd.f32 %v1335_v2, %v2767_v61 }
 0x20e   :  { %1699 = vst.msk [vmem:[%s3072_s8 + $0x44] sm:$0xf] %vm1681_vm1, %v1883_v18  ;;  %v1882_v31 = vpack.c.bf16 %v1537_v47, %v1537_v47  ;;  %v1462_v24 = vmax.f32 %v1430_v20, 0.0  ;;  %v1429_v25 = vadd.f32 %v2796_v13, %v1336_v21 }
 0x210   :  { %1698 = vst.msk [vmem:[%s3072_s8 + $0x40] sm:$0xf] %vm1681_vm1, %v1882_v31  ;;  %v1501_v60 = vmul.f32 %v2804_v19, %v1462_v24  ;;  %v1461_v26 = vmax.f32 %v1429_v25, 0.0 }
 0x211   :  { %v2245_v38 = vpop.f32.mrf.mxu1 }
 0x212   :  { %v1540_v61 = vadd.f32 %v2810_v22, %v1501_v60  ;;  %v1500_v27 = vmul.f32 %v2804_v19, %v1461_v26  ;;  %v1351_v28 = vadd.f32 %v2245_v38, %v2769_v62 }
 0x213   :  { %v1345_v9 = vpop.f32.mrf.mxu1 }
 0x214   :  { %v1885_v50 = vpack.c.bf16 %v1540_v61, %v1540_v61  ;;  %v1539_v29 = vadd.f32 %v2810_v22, %v1500_v27  ;;  %v1432_v32 = vadd.f32 %v2796_v13, %v1351_v28  ;;  %v1346_v53 = vadd.f32 %v1345_v9, %v2771_v63 }
 0x216   :  { %1701 = vst.msk [vmem:[%s3072_s8 + $0x4c] sm:$0xf] %vm1681_vm1, %v1885_v50  ;;  %v1884_v16 = vpack.c.bf16 %v1539_v29, %v1539_v29  ;;  %v1464_v33 = vmax.f32 %v1432_v32, 0.0  ;;  %v1431_v34 = vadd.f32 %v2796_v13, %v1346_v53 }
 0x218   :  { %1700 = vst.msk [vmem:[%s3072_s8 + $0x48] sm:$0xf] %vm1681_vm1, %v1884_v16  ;;  %v1503_v62 = vmul.f32 %v2804_v19, %v1464_v33  ;;  %v1463_v35 = vmax.f32 %v1431_v34, 0.0 }
 0x219   :  { %v2248_v36 = vpop.f32.mrf.mxu1 }
 0x21a   :  { %v1542_v63 = vadd.f32 %v2810_v22, %v1503_v62  ;;  %v1502_v37 = vmul.f32 %v2804_v19, %v1463_v35  ;;  %v1361_v45 = vadd.f32 %v2248_v36, %v2773_v0 }
 0x21b   :  { %v1355_v40 = vpop.f32.mrf.mxu1 }
 0x21c   :  { %v1887_v41 = vpack.c.bf16 %v1542_v63, %v1542_v63  ;;  %v1541_v52 = vadd.f32 %v2810_v22, %v1502_v37  ;;  %v1434_v55 = vadd.f32 %v2796_v13, %v1361_v45  ;;  %v1356_v42 = vadd.f32 %v1355_v40, %v2775_v1 }
 0x21e   :  { %1703 = vst.msk [vmem:[%s3072_s8 + $0x54] sm:$0xf] %vm1681_vm1, %v1887_v41  ;;  %v1886_v23 = vpack.c.bf16 %v1541_v52, %v1541_v52  ;;  %v1466_v56 = vmax.f32 %v1434_v55, 0.0  ;;  %v1433_v43 = vadd.f32 %v2796_v13, %v1356_v42 }
 0x220   :  { %1702 = vst.msk [vmem:[%s3072_s8 + $0x50] sm:$0xf] %vm1681_vm1, %v1886_v23  ;;  %v1505_v0 = vmul.f32 %v2804_v19, %v1466_v56  ;;  %v1465_v44 = vmax.f32 %v1433_v43, 0.0 }
 0x221   :  { %v2251_v30 = vpop.f32.mrf.mxu1 }
 0x222   :  { %v1544_v1 = vadd.f32 %v2810_v22, %v1505_v0  ;;  %v1504_v46 = vmul.f32 %v2804_v19, %v1465_v44  ;;  %v1371_v48 = vadd.f32 %v2251_v30, %v2777_v3 }
 0x223   :  { %v1365_v49 = vpop.f32.mrf.mxu1 }
 0x224   :  { %v1889_v51 = vpack.c.bf16 %v1544_v1, %v1544_v1  ;;  %v1543_v54 = vadd.f32 %v2810_v22, %v1504_v46  ;;  %v1436_v12 = vadd.f32 %v2796_v13, %v1371_v48  ;;  %v1366_v14 = vadd.f32 %v1365_v49, %v2779_v4 }
 0x226   :  { %1705 = vst.msk [vmem:[%s3072_s8 + $0x5c] sm:$0xf] %vm1681_vm1, %v1889_v51  ;;  %v1888_v57 = vpack.c.bf16 %v1543_v54, %v1543_v54  ;;  %v1468_v59 = vmax.f32 %v1436_v12, 0.0  ;;  %v1435_v15 = vadd.f32 %v2796_v13, %v1366_v14 }
 0x228   :  { %1704 = vst.msk [vmem:[%s3072_s8 + $0x58] sm:$0xf] %vm1681_vm1, %v1888_v57  ;;  %v1507_v3 = vmul.f32 %v2804_v19, %v1468_v59  ;;  %v1467_v58 = vmax.f32 %v1435_v15, 0.0 }
 0x229   :  { %v2254_v17 = vpop.f32.mrf.mxu1 }
 0x22a   :  { %v1546_v4 = vadd.f32 %v2810_v22, %v1507_v3  ;;  %v1506_v39 = vmul.f32 %v2804_v19, %v1467_v58  ;;  %v1381_v2 = vadd.f32 %v2254_v17, %v2781_v5 }
 0x22b   :  { %v1375_v18 = vpop.f32.mrf.mxu1 }
 0x22c   :  { %v1891_v47 = vpack.c.bf16 %v1546_v4, %v1546_v4  ;;  %v1545_v20 = vadd.f32 %v2810_v22, %v1506_v39  ;;  %v1438_v21 = vadd.f32 %v2796_v13, %v1381_v2  ;;  %v1376_v31 = vadd.f32 %v1375_v18, %v2783_v6 }
 0x22e   :  { %1707 = vst.msk [vmem:[%s3072_s8 + $0x64] sm:$0xf] %vm1681_vm1, %v1891_v47  ;;  %v1890_v24 = vpack.c.bf16 %v1545_v20, %v1545_v20  ;;  %v1470_v25 = vmax.f32 %v1438_v21, 0.0  ;;  %v1437_v60 = vadd.f32 %v2796_v13, %v1376_v31 }
 0x230   :  { %1706 = vst.msk [vmem:[%s3072_s8 + $0x60] sm:$0xf] %vm1681_vm1, %v1890_v24  ;;  %v1509_v5 = vmul.f32 %v2804_v19, %v1470_v25  ;;  %v1469_v26 = vmax.f32 %v1437_v60, 0.0 }
 0x231   :  { %v2257_v38 = vpop.f32.mrf.mxu1 }
 0x232   :  { %v1548_v6 = vadd.f32 %v2810_v22, %v1509_v5  ;;  %v1508_v61 = vmul.f32 %v2804_v19, %v1469_v26  ;;  %v1391_v27 = vadd.f32 %v2257_v38, %v2785_v7 }
 0x233   :  { %v1385_v28 = vpop.f32.mrf.mxu1 }
 0x234   :  { %v1893_v9 = vpack.c.bf16 %v1548_v6, %v1548_v6  ;;  %v1547_v50 = vadd.f32 %v2810_v22, %v1508_v61  ;;  %v1440_v29 = vadd.f32 %v2796_v13, %v1391_v27  ;;  %v1386_v32 = vadd.f32 %v1385_v28, %v2787_v8 }
 0x236   :  { %1709 = vst.msk [vmem:[%s3072_s8 + $0x6c] sm:$0xf] %vm1681_vm1, %v1893_v9  ;;  %v1892_v53 = vpack.c.bf16 %v1547_v50, %v1547_v50  ;;  %v1472_v16 = vmax.f32 %v1440_v29, 0.0  ;;  %v1439_v33 = vadd.f32 %v2796_v13, %v1386_v32 }
 0x238   :  { %1708 = vst.msk [vmem:[%s3072_s8 + $0x68] sm:$0xf] %vm1681_vm1, %v1892_v53  ;;  %v1511_v7 = vmul.f32 %v2804_v19, %v1472_v16  ;;  %v1471_v34 = vmax.f32 %v1439_v33, 0.0 }
 0x239   :  { %v2260_v62 = vpop.f32.mrf.mxu1 }
 0x23a   :  { %v1550_v8 = vadd.f32 %v2810_v22, %v1511_v7  ;;  %v1510_v35 = vmul.f32 %v2804_v19, %v1471_v34  ;;  %v1401_v36 = vadd.f32 %v2260_v62, %v2789_v10 }
 0x23b   :  { %v1395_v63 = vpop.f32.mrf.mxu1 }
 0x23c   :  { %v1895_v37 = vpack.c.bf16 %v1550_v8, %v1550_v8  ;;  %v1549_v45 = vadd.f32 %v2810_v22, %v1510_v35  ;;  %v1442_v40 = vadd.f32 %v2796_v13, %v1401_v36  ;;  %v1396_v41 = vadd.f32 %v1395_v63, %v2791_v11 }
 0x23e   :  { %1711 = vst.msk [vmem:[%s3072_s8 + $0x74] sm:$0xf] %vm1681_vm1, %v1895_v37  ;;  %v1894_v52 = vpack.c.bf16 %v1549_v45, %v1549_v45  ;;  %v1474_v55 = vmax.f32 %v1442_v40, 0.0  ;;  %v1441_v42 = vadd.f32 %v2796_v13, %v1396_v41 }
 0x240   :  { %1710 = vst.msk [vmem:[%s3072_s8 + $0x70] sm:$0xf] %vm1681_vm1, %v1894_v52  ;;  %v1513_v10 = vmul.f32 %v2804_v19, %v1474_v55  ;;  %v1473_v23 = vmax.f32 %v1441_v42, 0.0 }
 0x242   :  { %v1552_v56 = vadd.f32 %v2810_v22, %v1513_v10  ;;  %v1512_v11 = vmul.f32 %v2804_v19, %v1473_v23 }
 0x244   :  { %v1897_v43 = vpack.c.bf16 %v1552_v56, %v1552_v56  ;;  %v1551_v0 = vadd.f32 %v2810_v22, %v1512_v11 }
 0x246   :  { %1713 = vst.msk [vmem:[%s3072_s8 + $0x7c] sm:$0xf] %vm1681_vm1, %v1897_v43  ;;  %v1896_v13 = vpack.c.bf16 %v1551_v0, %v1551_v0 }
 0x248   :  { %1712 = vst.msk [vmem:[%s3072_s8 + $0x78] sm:$0xf] %vm1681_vm1, %v1896_v13 }
 0x249   :  { %1718 = vsyncpa [#allocation4], 1 }

</bundles_post_ra>
